<compile_context>
chip_gen: v7x
topology: tpu7x:2x2x1
jax: 0.10.0
libtpu: 0.0.40
codegen_flags: <defaults>
</compile_context>

<pallas_src>
import functools

import jax
import jax.numpy as jnp
from jax.experimental import pallas as pl
from jax.experimental.pallas import tpu as pltpu

N_CLS = 6
BN_EPS = 1e-5


# ----------------------------------------------------------------------------
# Parameters (Conv1d(k=1) + folded eval-mode BatchNorm1d)
# ----------------------------------------------------------------------------
def _fold_conv_bn(key, c_in, c_out, *, zero_bias=False, with_bn=True):
    """Deterministic Conv1d(kernel=1) [+ BatchNorm1d eval] -> (W[cin,cout], b[1,cout])."""
    kw, kb = jax.random.split(key)
    bound = 1.0 / jnp.sqrt(jnp.float32(c_in))
    w = jax.random.uniform(kw, (c_in, c_out), jnp.float32, -bound, bound)
    if zero_bias:
        b = jnp.zeros((c_out,), jnp.float32)      # t_mlp[-1].bias.data.zero_()
    else:
        b = jax.random.uniform(kb, (c_out,), jnp.float32, -bound, bound)
    if with_bn:
        gamma = jnp.ones((c_out,), jnp.float32)
        beta = jnp.zeros((c_out,), jnp.float32)
        r_mean = jnp.zeros((c_out,), jnp.float32)
        r_var = jnp.ones((c_out,), jnp.float32)
        s = gamma / jnp.sqrt(r_var + BN_EPS)
        w = w * s[None, :]
        b = (b - r_mean) * s + beta
    return w, b.reshape(1, c_out)


def make_params(seed=0):
    keys = jax.random.split(jax.random.PRNGKey(seed), 9)
    params = []
    # TODO(synk): PointNet2MSG (FPS + multi-scale ball-query grouping) is not
    # defined in the reference snippet; stand-in is a shared per-point MLP
    # encoder 9 -> 64 -> 128 -> 256 producing the 256-ch features the heads expect.
    params.append(_fold_conv_bn(keys[0], 9, 64))
    params.append(_fold_conv_bn(keys[1], 64, 128))
    params.append(_fold_conv_bn(keys[2], 128, 256))
    # t_mlp: 256->256(BN,ReLU)->128(BN,ReLU)->Dropout->3 (bias zeroed)
    params.append(_fold_conv_bn(keys[3], 256, 256))
    params.append(_fold_conv_bn(keys[4], 256, 128))
    params.append(_fold_conv_bn(keys[5], 128, 3, zero_bias=True, with_bn=False))
    # s_mlp: 256->256(BN,ReLU)->128(BN,ReLU)->Dropout->3*n_cls
    params.append(_fold_conv_bn(keys[6], 256, 256))
    params.append(_fold_conv_bn(keys[7], 256, 128))
    params.append(_fold_conv_bn(keys[8], 128, 3 * N_CLS, with_bn=False))
    return params


def pack_params(params):
    """Repack raw per-layer params into the fused / bf16 form the kernel wants.

    Call ONCE at load time (hoisted out of the jitted forward).
    """
    (w0, b0), (w1, b1), (w2, b2) = params[0:3]
    (wt1, bt1), (wt2, bt2), (wt3, bt3) = params[3:6]
    (ws1, bs1), (ws2, bs2), (ws3, bs3) = params[6:9]
    bf = jnp.bfloat16

    # cat([pts, pts, rgb]) removed: duplicated pts columns folded, pts|rgb merged
    # into a single 6-channel first-layer weight.
    w6 = jnp.concatenate([w0[0:3] + w0[3:6], w0[6:9]], axis=0).astype(bf)   # (6, 64)

    # fuse first layers of t_mlp and s_mlp: one 256->512 matmul.
    wh1 = jnp.concatenate([wt1, ws1], axis=1).astype(bf)                     # (256, 512)
    bh1 = jnp.concatenate([bt1, bs1], axis=1)                                # (1, 512) f32

    # fuse the two (linear) final layers into one lane-padded (256, 128) matmul,
    # kept in f32 (only TB rows -> negligible cost, better numerics):
    # columns 0:3 <- t head, columns 3:3+3*N_CLS <- s head, rest zero.
    wfin = jnp.zeros((256, 128), jnp.float32)
    wfin = wfin.at[0:128, 0:3].set(wt3)
    wfin = wfin.at[128:256, 3:3 + 3 * N_CLS].set(ws3)
    bfin = jnp.zeros((1, 128), jnp.float32)
    bfin = bfin.at[:, 0:3].set(bt3).at[:, 3:3 + 3 * N_CLS].set(bs3)

    # selector placing the pooled-pts residual into lanes 0:3 (f32).
    wres = jnp.zeros((3, 128), jnp.float32)
    wres = wres.at[0, 0].set(1.0).at[1, 1].set(1.0).at[2, 2].set(1.0)

    return [w6, b0,
            w1.astype(bf), b1,
            w2.astype(bf), b2,
            wh1, bh1,
            wt2.astype(bf), bt2,
            ws2.astype(bf), bs2,
            wfin, bfin,
            wres]


# ----------------------------------------------------------------------------
# Kernel
# ----------------------------------------------------------------------------
def _net_kernel(x6_ref,
                w6_ref, b0_ref,
                w1_ref, b1_ref,
                w2_ref, b2_ref,
                wh1_ref, bh1_ref,
                wt2_ref, bt2_ref,
                ws2_ref, bs2_ref,
                wfin_ref, bfin_ref,
                wres_ref,
                out_ref,
                acc_z, acc_p,
                *, n_points):
    TB, TN, _ = x6_ref.shape
    j = pl.program_id(1)

    # ---- init accumulators on the first N-chunk -----------------------------
    @pl.when(j == 0)
    def _():
        acc_z[...] = jnp.zeros_like(acc_z)
        acc_p[...] = jnp.zeros_like(acc_p)

    def mm(a_bf16, w_ref):
        # bf16 MXU matmul, f32 accumulation.
        return jnp.dot(a_bf16, w_ref[...], preferred_element_type=jnp.float32)

    def act(y_f32, b_ref):
        # bias + ReLU, then a single cast to bf16 (feeds the next MXU matmul).
        return jnp.maximum(y_f32 + b_ref[...], 0.0).astype(jnp.bfloat16)

    x6 = x6_ref[...]                                 # (TB, TN, 6) f32
    pts = x6[:, :, 0:3]                              # f32 residual source
    xb = x6.reshape(TB * TN, 6).astype(jnp.bfloat16)

    # --- backbone stand-in (shared per-point MLP; cat([pts,pts,rgb]) folded) --
    x = act(mm(xb, w6_ref), b0_ref)                  # (M, 64)  bf16
    x = act(mm(x, w1_ref), b1_ref)                   # (M, 128) bf16
    x = act(mm(x, w2_ref), b2_ref)                   # (M, 256) bf16

    # --- heads: fused first layer, then per-head second layer -----------------
    h = act(mm(x, wh1_ref), bh1_ref)                 # (M, 512) bf16
    # t2/s2 only feed the pooling sum -> keep f32 (no extra cast, better numerics)
    t2 = jnp.maximum(mm(h[:, 0:256], wt2_ref) + bt2_ref[...], 0.0)     # (M, 128) f32
    s2 = jnp.maximum(mm(h[:, 256:512], ws2_ref) + bs2_ref[...], 0.0)   # (M, 128) f32

    # --- accumulate per-point sums (mean + final layers are linear: exact) ----
    sum_t = jnp.sum(t2.reshape(TB, TN, 128), axis=1)                    # (TB, 128)
    sum_s = jnp.sum(s2.reshape(TB, TN, 128), axis=1)                    # (TB, 128)
    acc_z[...] += jnp.concatenate([sum_t, sum_s], axis=-1)              # (TB, 256)
    # pts-sum routed to lanes 0:3 via a tiny f32 selector matmul (layout-safe).
    acc_p[...] += jnp.dot(jnp.sum(pts, axis=1), wres_ref[...],
                          preferred_element_type=jnp.float32)           # (TB, 128)

    # ---- finalize on the last N-chunk ----------------------------------------
    @pl.when(j == pl.num_programs(1) - 1)
    def _():
        inv_n = jnp.float32(1.0 / n_points)
        z = acc_z[...] * inv_n                                           # (TB, 256) f32
        head = jnp.dot(z, wfin_ref[...],
                       preferred_element_type=jnp.float32) + bfin_ref[...]
        out_ref[...] = (head + acc_p[...] * inv_n).reshape(TB, 1, 128)


# ----------------------------------------------------------------------------
# Wrapper
# ----------------------------------------------------------------------------
def _pick_tiles(B, N, row_cap=2048):
    """Choose (TB, TN): TN is the largest sublane-aligned divisor of N under the
    row cap (the N axis is the reduction/pipeline axis), then TB is the largest
    divisor of B that keeps TB*TN rows under the cap.  No forced >=2 grid steps
    (pure overhead on single-TC chips); on v7x the 'parallel' B axis is still
    split across cores whenever B // TB >= 2."""
    tn_cands = [d for d in range(1, N + 1) if N % d == 0 and d % 8 == 0 and d <= row_cap]
    tn = max(tn_cands) if tn_cands else N
    tb_cands = [d for d in range(1, B + 1) if B % d == 0 and d * tn <= row_cap]
    tb = max(tb_cands) if tb_cands else 1
    return tb, tn


def _vmem_limit_bytes(rows):
    """Scoped-VMEM request derived from the per-step working set:
    double-buffered padded f32 input block (6 lanes pad to 128), bf16
    activations (64+128+256+512 ch), f32 t2/s2 + largest pre-cast f32
    transient (512 ch), plus ~2 MiB of resident weights.  Clamped to
    [32 MiB, 56 MiB]: >= v5e's 16 MiB default, <= v7x's 64 MiB physical."""
    per_row = 2 * 4 * 128 + 2 * (64 + 128 + 256 + 512) + 4 * (128 + 128 + 512)
    est = rows * per_row + (2 << 20)
    return int(min(max(2 * est, 32 << 20), 56 << 20))


def net_forward(packed, rgb, pts, category_label, *, tile_b=None, tile_n=None):
    B, N, _ = pts.shape
    # cat([pts, pts, rgb]) folded into the (6,64) first-layer weight: the kernel
    # only needs the merged (B, N, 6) slab.
    x6 = jnp.concatenate([pts, rgb], axis=-1)

    TB, TN = _pick_tiles(B, N)
    if tile_b is not None:
        TB = tile_b
    if tile_n is not None:
        TN = tile_n
    assert B % TB == 0 and N % TN == 0
    grid = (B // TB, N // TN)

    in_specs = [pl.BlockSpec((TB, TN, 6), lambda i, j: (i, j, 0))]
    for arr in packed:   # all packed params are 2-D, resident across the grid
        in_specs.append(pl.BlockSpec(arr.shape, lambda i, j: (0, 0)))

    slab = pl.pallas_call(
        functools.partial(_net_kernel, n_points=N),
        out_shape=jax.ShapeDtypeStruct((B, 1, 128), jnp.float32),
        grid=grid,
        in_specs=in_specs,
        out_specs=pl.BlockSpec((TB, 1, 128), lambda i, j: (i, 0, 0)),
        scratch_shapes=[pltpu.VMEM((TB, 256), jnp.float32),   # sum_t | sum_s
                        pltpu.VMEM((TB, 128), jnp.float32)],  # pts sum in lanes 0:3
        compiler_params=pltpu.CompilerParams(
            dimension_semantics=("parallel", "arbitrary"),
            vmem_limit_bytes=_vmem_limit_bytes(TB * TN)),
    )(x6, *packed)

    slab = slab[:, 0, :]                                  # (B, 128)
    t = slab[:, 0:3]                                      # translation (+ pts mean)
    s = slab[:, 3:3 + 3 * N_CLS].reshape(B, N_CLS, 3)     # class-major, matches
                                                          # reshape(B, n_cls, 3, N)
    cls = category_label.astype(jnp.int32)
    s = s[jnp.arange(B), cls, :]                          # torch.gather + squeeze
    return {"translation": t, "size": s}


# ----------------------------------------------------------------------------
# Pure-JAX reference (f32, unfused) for a correctness sanity check
# ----------------------------------------------------------------------------
def _mlp_ref(x, layers):
    (wa, ba), (wb, bb), (wc, bc) = layers
    y = jnp.maximum(jnp.dot(x, wa) + ba, 0.0)
    y = jnp.maximum(jnp.dot(y, wb) + bb, 0.0)
    return jnp.dot(y, wc) + bc          # dropout is identity in eval


def net_reference(params, rgb, pts, category_label):
    B, N, _ = pts.shape
    x = jnp.concatenate([pts, pts, rgb], axis=-1)
    for (w, b) in params[0:3]:
        x = jnp.maximum(jnp.dot(x, w) + b, 0.0)
    t = jnp.mean(_mlp_ref(x, params[3:6]) + pts, axis=1)
    s = jnp.mean(_mlp_ref(x, params[6:9]), axis=1).reshape(B, N_CLS, 3)
    s = s[jnp.arange(B), category_label.astype(jnp.int32), :]
    return {"translation": t, "size": s}


if __name__ == "__main__":
    B, N = 4, 128
    key = jax.random.PRNGKey(0)
    k_rgb, k_pts, k_cls = jax.random.split(key, 3)
    rgb = jax.random.uniform(k_rgb, (B, N, 3), jnp.float32)
    pts = jax.random.normal(k_pts, (B, N, 3), jnp.float32) * 0.1
    category_label = jax.random.randint(k_cls, (B,), 0, N_CLS, jnp.int32)

    params = make_params(seed=0)
    packed = pack_params(params)                 # packed ONCE, outside the jitted fwd

    # tile_b=2 / tile_n=64 -> grid (2, 2): exercises both the parallel B axis
    # and the N reduction axis (accumulator init / finalize) at a small size.
    fwd = jax.jit(functools.partial(net_forward, tile_b=2, tile_n=64))
    out = fwd(packed, rgb, pts, category_label)
    jax.block_until_ready(out)

    assert out["translation"].shape == (B, 3)
    assert out["size"].shape == (B, 3)
    assert bool(jnp.all(jnp.isfinite(out["translation"])))
    assert bool(jnp.all(jnp.isfinite(out["size"])))

    ref = net_reference(params, rgb, pts, category_label)
    assert bool(jnp.allclose(out["translation"], ref["translation"], rtol=5e-2, atol=5e-2))
    assert bool(jnp.allclose(out["size"], ref["size"], rtol=5e-2, atol=5e-2))

    print("KERNEL_OK")
</pallas_src>

<mosaic_0001>
module attributes {stable_mosaic.version = 11 : i64} {
  func.func @_net_kernel(%arg0: i32, %arg1: i32, %arg2: memref<2x64x6xf32, #tpu.memory_space<vmem>>, %arg3: memref<6x64xbf16, #tpu.memory_space<vmem>>, %arg4: memref<1x64xf32, #tpu.memory_space<vmem>>, %arg5: memref<64x128xbf16, #tpu.memory_space<vmem>>, %arg6: memref<1x128xf32, #tpu.memory_space<vmem>>, %arg7: memref<128x256xbf16, #tpu.memory_space<vmem>>, %arg8: memref<1x256xf32, #tpu.memory_space<vmem>>, %arg9: memref<256x512xbf16, #tpu.memory_space<vmem>>, %arg10: memref<1x512xf32, #tpu.memory_space<vmem>>, %arg11: memref<256x128xbf16, #tpu.memory_space<vmem>>, %arg12: memref<1x128xf32, #tpu.memory_space<vmem>>, %arg13: memref<256x128xbf16, #tpu.memory_space<vmem>>, %arg14: memref<1x128xf32, #tpu.memory_space<vmem>>, %arg15: memref<256x128xf32, #tpu.memory_space<vmem>>, %arg16: memref<1x128xf32, #tpu.memory_space<vmem>>, %arg17: memref<3x128xf32, #tpu.memory_space<vmem>>, %arg18: memref<2x1x128xf32, #tpu.memory_space<vmem>>, %arg19: memref<2x256xf32, #tpu.memory_space<vmem>>, %arg20: memref<2x128xf32, #tpu.memory_space<vmem>>) attributes {dimension_semantics = [#tpu.dimension_semantics<parallel>, #tpu.dimension_semantics<arbitrary>], iteration_bounds = array<i64: 2, 2>, scalar_prefetch = 0 : i64, scratch_operands = 2 : i64, tpu.core_type = #tpu.core_type<tc>, window_params = [{transform_indices = @transform_0, window_bounds = array<i64: 2, 64, 6>}, {pipeline_mode = #tpu.pipeline_mode<synchronous>, transform_indices = @transform_1, window_bounds = array<i64: 6, 64>}, {pipeline_mode = #tpu.pipeline_mode<synchronous>, transform_indices = @transform_2, window_bounds = array<i64: 1, 64>}, {pipeline_mode = #tpu.pipeline_mode<synchronous>, transform_indices = @transform_3, window_bounds = array<i64: 64, 128>}, {pipeline_mode = #tpu.pipeline_mode<synchronous>, transform_indices = @transform_4, window_bounds = array<i64: 1, 128>}, {pipeline_mode = #tpu.pipeline_mode<synchronous>, transform_indices = @transform_5, window_bounds = array<i64: 128, 256>}, {pipeline_mode = #tpu.pipeline_mode<synchronous>, transform_indices = @transform_6, window_bounds = array<i64: 1, 256>}, {pipeline_mode = #tpu.pipeline_mode<synchronous>, transform_indices = @transform_7, window_bounds = array<i64: 256, 512>}, {pipeline_mode = #tpu.pipeline_mode<synchronous>, transform_indices = @transform_8, window_bounds = array<i64: 1, 512>}, {pipeline_mode = #tpu.pipeline_mode<synchronous>, transform_indices = @transform_9, window_bounds = array<i64: 256, 128>}, {pipeline_mode = #tpu.pipeline_mode<synchronous>, transform_indices = @transform_10, window_bounds = array<i64: 1, 128>}, {pipeline_mode = #tpu.pipeline_mode<synchronous>, transform_indices = @transform_11, window_bounds = array<i64: 256, 128>}, {pipeline_mode = #tpu.pipeline_mode<synchronous>, transform_indices = @transform_12, window_bounds = array<i64: 1, 128>}, {pipeline_mode = #tpu.pipeline_mode<synchronous>, transform_indices = @transform_13, window_bounds = array<i64: 256, 128>}, {pipeline_mode = #tpu.pipeline_mode<synchronous>, transform_indices = @transform_14, window_bounds = array<i64: 1, 128>}, {pipeline_mode = #tpu.pipeline_mode<synchronous>, transform_indices = @transform_15, window_bounds = array<i64: 3, 128>}, {transform_indices = @transform_16, window_bounds = array<i64: 2, 1, 128>}]} {
    %c0_i32 = arith.constant 0 : i32
    %0 = arith.cmpi eq, %arg1, %c0_i32 : i32
    %1 = arith.extui %0 : i1 to i32
    %c0_i32_0 = arith.constant 0 : i32
    %2 = arith.cmpi ne, %1, %c0_i32_0 : i32
    scf.if %2 {
      %cst_53 = arith.constant 0.000000e+00 : f32
      %72 = vector.broadcast %cst_53 : f32 to vector<2x256xf32>
      %c0_54 = arith.constant 0 : index
      %c0_55 = arith.constant 0 : index
      %73 = vector.load %arg19[%c0_54, %c0_55] : memref<2x256xf32, #tpu.memory_space<vmem>>, vector<2x256xf32>
      tpu.vector_store %arg19[%c0_54, %c0_55], %72 {strides = array<i32>} : memref<2x256xf32, #tpu.memory_space<vmem>>, vector<2x256xf32>,
      %cst_56 = arith.constant 0.000000e+00 : f32
      %74 = vector.broadcast %cst_56 : f32 to vector<2x128xf32>
      %c0_57 = arith.constant 0 : index
      %c0_58 = arith.constant 0 : index
      %75 = vector.load %arg20[%c0_57, %c0_58] : memref<2x128xf32, #tpu.memory_space<vmem>>, vector<2x128xf32>
      tpu.vector_store %arg20[%c0_57, %c0_58], %74 {strides = array<i32>} : memref<2x128xf32, #tpu.memory_space<vmem>>, vector<2x128xf32>,
    } else {
    }
    %c0 = arith.constant 0 : index
    %c0_1 = arith.constant 0 : index
    %c0_2 = arith.constant 0 : index
    %3 = vector.load %arg2[%c0, %c0_1, %c0_2] : memref<2x64x6xf32, #tpu.memory_space<vmem>>, vector<2x64x6xf32>
    %4 = vector.extract_strided_slice %3 {offsets = [0, 0, 0], sizes = [2, 64, 3], strides = [1, 1, 1]} : vector<2x64x6xf32> to vector<2x64x3xf32>
    %5 = vector.shape_cast %3 : vector<2x64x6xf32> to vector<128x6xf32>
    %6 = arith.truncf %5 : vector<128x6xf32> to vector<128x6xbf16>
    %c0_3 = arith.constant 0 : index
    %c0_4 = arith.constant 0 : index
    %7 = vector.load %arg3[%c0_3, %c0_4] : memref<6x64xbf16, #tpu.memory_space<vmem>>, vector<6x64xbf16>
    %cst = arith.constant dense<0.000000e+00> : vector<128x64xf32>
    %8 = tpu.matmul %6, %7, %cst {dimension_numbers = #tpu.dot_dimension_numbers<[1], [0], [0], [1], [0, 0, 1, 1], [], []>} : vector<128x6xbf16>, vector<6x64xbf16>, vector<128x64xf32> -> vector<128x64xf32>
    %c0_5 = arith.constant 0 : index
    %c0_6 = arith.constant 0 : index
    %9 = vector.load %arg4[%c0_5, %c0_6] : memref<1x64xf32, #tpu.memory_space<vmem>>, vector<1x64xf32>
    %10 = vector.broadcast %9 : vector<1x64xf32> to vector<128x64xf32>
    %11 = arith.addf %8, %10 : vector<128x64xf32>
    %cst_7 = arith.constant 0.000000e+00 : f32
    %12 = vector.broadcast %cst_7 : f32 to vector<128x64xf32>
    %13 = arith.maximumf %11, %12 : vector<128x64xf32>
    %14 = arith.truncf %13 : vector<128x64xf32> to vector<128x64xbf16>
    %c0_8 = arith.constant 0 : index
    %c0_9 = arith.constant 0 : index
    %15 = vector.load %arg5[%c0_8, %c0_9] : memref<64x128xbf16, #tpu.memory_space<vmem>>, vector<64x128xbf16>
    %cst_10 = arith.constant dense<0.000000e+00> : vector<128x128xf32>
    %16 = tpu.matmul %14, %15, %cst_10 {dimension_numbers = #tpu.dot_dimension_numbers<[1], [0], [0], [1], [0, 0, 1, 1], [], []>} : vector<128x64xbf16>, vector<64x128xbf16>, vector<128x128xf32> -> vector<128x128xf32>
    %c0_11 = arith.constant 0 : index
    %c0_12 = arith.constant 0 : index
    %17 = vector.load %arg6[%c0_11, %c0_12] : memref<1x128xf32, #tpu.memory_space<vmem>>, vector<1x128xf32>
    %18 = vector.broadcast %17 : vector<1x128xf32> to vector<128x128xf32>
    %19 = arith.addf %16, %18 : vector<128x128xf32>
    %cst_13 = arith.constant 0.000000e+00 : f32
    %20 = vector.broadcast %cst_13 : f32 to vector<128x128xf32>
    %21 = arith.maximumf %19, %20 : vector<128x128xf32>
    %22 = arith.truncf %21 : vector<128x128xf32> to vector<128x128xbf16>
    %c0_14 = arith.constant 0 : index
    %c0_15 = arith.constant 0 : index
    %23 = vector.load %arg7[%c0_14, %c0_15] : memref<128x256xbf16, #tpu.memory_space<vmem>>, vector<128x256xbf16>
    %cst_16 = arith.constant dense<0.000000e+00> : vector<128x256xf32>
    %24 = tpu.matmul %22, %23, %cst_16 {dimension_numbers = #tpu.dot_dimension_numbers<[1], [0], [0], [1], [0, 0, 1, 1], [], []>} : vector<128x128xbf16>, vector<128x256xbf16>, vector<128x256xf32> -> vector<128x256xf32>
    %c0_17 = arith.constant 0 : index
    %c0_18 = arith.constant 0 : index
    %25 = vector.load %arg8[%c0_17, %c0_18] : memref<1x256xf32, #tpu.memory_space<vmem>>, vector<1x256xf32>
    %26 = vector.broadcast %25 : vector<1x256xf32> to vector<128x256xf32>
    %27 = arith.addf %24, %26 : vector<128x256xf32>
    %cst_19 = arith.constant 0.000000e+00 : f32
    %28 = vector.broadcast %cst_19 : f32 to vector<128x256xf32>
    %29 = arith.maximumf %27, %28 : vector<128x256xf32>
    %30 = arith.truncf %29 : vector<128x256xf32> to vector<128x256xbf16>
    %c0_20 = arith.constant 0 : index
    %c0_21 = arith.constant 0 : index
    %31 = vector.load %arg9[%c0_20, %c0_21] : memref<256x512xbf16, #tpu.memory_space<vmem>>, vector<256x512xbf16>
    %cst_22 = arith.constant dense<0.000000e+00> : vector<128x512xf32>
    %32 = tpu.matmul %30, %31, %cst_22 {dimension_numbers = #tpu.dot_dimension_numbers<[1], [0], [0], [1], [0, 0, 1, 1], [], []>} : vector<128x256xbf16>, vector<256x512xbf16>, vector<128x512xf32> -> vector<128x512xf32>
    %c0_23 = arith.constant 0 : index
    %c0_24 = arith.constant 0 : index
    %33 = vector.load %arg10[%c0_23, %c0_24] : memref<1x512xf32, #tpu.memory_space<vmem>>, vector<1x512xf32>
    %34 = vector.broadcast %33 : vector<1x512xf32> to vector<128x512xf32>
    %35 = arith.addf %32, %34 : vector<128x512xf32>
    %cst_25 = arith.constant 0.000000e+00 : f32
    %36 = vector.broadcast %cst_25 : f32 to vector<128x512xf32>
    %37 = arith.maximumf %35, %36 : vector<128x512xf32>
    %38 = arith.truncf %37 : vector<128x512xf32> to vector<128x512xbf16>
    %39 = vector.extract_strided_slice %38 {offsets = [0, 0], sizes = [128, 256], strides = [1, 1]} : vector<128x512xbf16> to vector<128x256xbf16>
    %c0_26 = arith.constant 0 : index
    %c0_27 = arith.constant 0 : index
    %40 = vector.load %arg11[%c0_26, %c0_27] : memref<256x128xbf16, #tpu.memory_space<vmem>>, vector<256x128xbf16>
    %cst_28 = arith.constant dense<0.000000e+00> : vector<128x128xf32>
    %41 = tpu.matmul %39, %40, %cst_28 {dimension_numbers = #tpu.dot_dimension_numbers<[1], [0], [0], [1], [0, 0, 1, 1], [], []>} : vector<128x256xbf16>, vector<256x128xbf16>, vector<128x128xf32> -> vector<128x128xf32>
    %c0_29 = arith.constant 0 : index
    %c0_30 = arith.constant 0 : index
    %42 = vector.load %arg12[%c0_29, %c0_30] : memref<1x128xf32, #tpu.memory_space<vmem>>, vector<1x128xf32>
    %43 = vector.broadcast %42 : vector<1x128xf32> to vector<128x128xf32>
    %44 = arith.addf %41, %43 : vector<128x128xf32>
    %cst_31 = arith.constant 0.000000e+00 : f32
    %45 = vector.broadcast %cst_31 : f32 to vector<128x128xf32>
    %46 = arith.maximumf %44, %45 : vector<128x128xf32>
    %47 = vector.extract_strided_slice %38 {offsets = [0, 256], sizes = [128, 256], strides = [1, 1]} : vector<128x512xbf16> to vector<128x256xbf16>
    %c0_32 = arith.constant 0 : index
    %c0_33 = arith.constant 0 : index
    %48 = vector.load %arg13[%c0_32, %c0_33] : memref<256x128xbf16, #tpu.memory_space<vmem>>, vector<256x128xbf16>
    %cst_34 = arith.constant dense<0.000000e+00> : vector<128x128xf32>
    %49 = tpu.matmul %47, %48, %cst_34 {dimension_numbers = #tpu.dot_dimension_numbers<[1], [0], [0], [1], [0, 0, 1, 1], [], []>} : vector<128x256xbf16>, vector<256x128xbf16>, vector<128x128xf32> -> vector<128x128xf32>
    %c0_35 = arith.constant 0 : index
    %c0_36 = arith.constant 0 : index
    %50 = vector.load %arg14[%c0_35, %c0_36] : memref<1x128xf32, #tpu.memory_space<vmem>>, vector<1x128xf32>
    %51 = vector.broadcast %50 : vector<1x128xf32> to vector<128x128xf32>
    %52 = arith.addf %49, %51 : vector<128x128xf32>
    %cst_37 = arith.constant 0.000000e+00 : f32
    %53 = vector.broadcast %cst_37 : f32 to vector<128x128xf32>
    %54 = arith.maximumf %52, %53 : vector<128x128xf32>
    %55 = vector.shape_cast %46 : vector<128x128xf32> to vector<2x64x128xf32>
    %cst_38 = arith.constant dense<0.000000e+00> : vector<2x128xf32>
    %56 = vector.multi_reduction <add>, %55, %cst_38 [1] : vector<2x64x128xf32> to vector<2x128xf32>
    %57 = vector.shape_cast %54 : vector<128x128xf32> to vector<2x64x128xf32>
    %cst_39 = arith.constant dense<0.000000e+00> : vector<2x128xf32>
    %58 = vector.multi_reduction <add>, %57, %cst_39 [1] : vector<2x64x128xf32> to vector<2x128xf32>
    %c0_40 = arith.constant 0 : index
    %c0_41 = arith.constant 0 : index
    %59 = vector.load %arg19[%c0_40, %c0_41] : memref<2x256xf32, #tpu.memory_space<vmem>>, vector<2x256xf32>
    %60 = tpu.concatenate %56, %58 in 1 : vector<2x128xf32>, vector<2x128xf32> -> vector<2x256xf32>
    %61 = arith.addf %59, %60 : vector<2x256xf32>
    %c0_42 = arith.constant 0 : index
    %c0_43 = arith.constant 0 : index
    %62 = vector.load %arg19[%c0_42, %c0_43] : memref<2x256xf32, #tpu.memory_space<vmem>>, vector<2x256xf32>
    tpu.vector_store %arg19[%c0_42, %c0_43], %61 {strides = array<i32>} : memref<2x256xf32, #tpu.memory_space<vmem>>, vector<2x256xf32>,
    %c0_44 = arith.constant 0 : index
    %c0_45 = arith.constant 0 : index
    %63 = vector.load %arg20[%c0_44, %c0_45] : memref<2x128xf32, #tpu.memory_space<vmem>>, vector<2x128xf32>
    %cst_46 = arith.constant dense<0.000000e+00> : vector<2x3xf32>
    %64 = vector.multi_reduction <add>, %4, %cst_46 [1] : vector<2x64x3xf32> to vector<2x3xf32>
    %c0_47 = arith.constant 0 : index
    %c0_48 = arith.constant 0 : index
    %65 = vector.load %arg17[%c0_47, %c0_48] : memref<3x128xf32, #tpu.memory_space<vmem>>, vector<3x128xf32>
    %cst_49 = arith.constant dense<0.000000e+00> : vector<2x128xf32>
    %66 = tpu.matmul %64, %65, %cst_49 {dimension_numbers = #tpu.dot_dimension_numbers<[1], [0], [0], [1], [0, 0, 1, 1], [], []>} : vector<2x3xf32>, vector<3x128xf32>, vector<2x128xf32> -> vector<2x128xf32>
    %67 = arith.addf %63, %66 : vector<2x128xf32>
    %c0_50 = arith.constant 0 : index
    %c0_51 = arith.constant 0 : index
    %68 = vector.load %arg20[%c0_50, %c0_51] : memref<2x128xf32, #tpu.memory_space<vmem>>, vector<2x128xf32>
    tpu.vector_store %arg20[%c0_50, %c0_51], %67 {strides = array<i32>} : memref<2x128xf32, #tpu.memory_space<vmem>>, vector<2x128xf32>,
    %c1_i32 = arith.constant 1 : i32
    %69 = arith.cmpi eq, %arg1, %c1_i32 : i32
    %70 = arith.extui %69 : i1 to i32
    %c0_i32_52 = arith.constant 0 : i32
    %71 = arith.cmpi ne, %70, %c0_i32_52 : i32
    scf.if %71 {
      %c0_53 = arith.constant 0 : index
      %c0_54 = arith.constant 0 : index
      %72 = vector.load %arg19[%c0_53, %c0_54] : memref<2x256xf32, #tpu.memory_space<vmem>>, vector<2x256xf32>
      %cst_55 = arith.constant 7.812500e-03 : f32
      %73 = vector.broadcast %cst_55 : f32 to vector<2x256xf32>
      %74 = arith.mulf %72, %73 : vector<2x256xf32>
      %c0_56 = arith.constant 0 : index
      %c0_57 = arith.constant 0 : index
      %75 = vector.load %arg15[%c0_56, %c0_57] : memref<256x128xf32, #tpu.memory_space<vmem>>, vector<256x128xf32>
      %cst_58 = arith.constant dense<0.000000e+00> : vector<2x128xf32>
      %76 = tpu.matmul %74, %75, %cst_58 {dimension_numbers = #tpu.dot_dimension_numbers<[1], [0], [0], [1], [0, 0, 1, 1], [], []>} : vector<2x256xf32>, vector<256x128xf32>, vector<2x128xf32> -> vector<2x128xf32>
      %c0_59 = arith.constant 0 : index
      %c0_60 = arith.constant 0 : index
      %77 = vector.load %arg16[%c0_59, %c0_60] : memref<1x128xf32, #tpu.memory_space<vmem>>, vector<1x128xf32>
      %78 = vector.broadcast %77 : vector<1x128xf32> to vector<2x128xf32>
      %79 = arith.addf %76, %78 : vector<2x128xf32>
      %c0_61 = arith.constant 0 : index
      %c0_62 = arith.constant 0 : index
      %80 = vector.load %arg20[%c0_61, %c0_62] : memref<2x128xf32, #tpu.memory_space<vmem>>, vector<2x128xf32>
      %cst_63 = arith.constant 7.812500e-03 : f32
      %81 = vector.broadcast %cst_63 : f32 to vector<2x128xf32>
      %82 = arith.mulf %80, %81 : vector<2x128xf32>
      %83 = arith.addf %79, %82 : vector<2x128xf32>
      %84 = vector.shape_cast %83 : vector<2x128xf32> to vector<2x1x128xf32>
      %c0_64 = arith.constant 0 : index
      %c0_65 = arith.constant 0 : index
      %c0_66 = arith.constant 0 : index
      %85 = vector.load %arg18[%c0_64, %c0_65, %c0_66] : memref<2x1x128xf32, #tpu.memory_space<vmem>>, vector<2x1x128xf32>
      tpu.vector_store %arg18[%c0_64, %c0_65, %c0_66], %84 {strides = array<i32>} : memref<2x1x128xf32, #tpu.memory_space<vmem>>, vector<2x1x128xf32>,
    } else {
    }
    return
  }
  func.func @transform_0(%arg0: i32, %arg1: i32) -> (i32, i32, i32) {
    %c0_i32 = arith.constant 0 : i32
    %c0_i32_0 = arith.constant 0 : i32
    return %arg0, %arg1, %c0_i32 : i32, i32, i32
  }
  func.func @transform_1(%arg0: i32, %arg1: i32) -> (i32, i32) {
    %c0_i32 = arith.constant 0 : i32
    %c0_i32_0 = arith.constant 0 : i32
    %c0_i32_1 = arith.constant 0 : i32
    return %c0_i32, %c0_i32_0 : i32, i32
  }
  func.func @transform_2(%arg0: i32, %arg1: i32) -> (i32, i32) {
    %c0_i32 = arith.constant 0 : i32
    %c0_i32_0 = arith.constant 0 : i32
    %c0_i32_1 = arith.constant 0 : i32
    return %c0_i32, %c0_i32_0 : i32, i32
  }
  func.func @transform_3(%arg0: i32, %arg1: i32) -> (i32, i32) {
    %c0_i32 = arith.constant 0 : i32
    %c0_i32_0 = arith.constant 0 : i32
    %c0_i32_1 = arith.constant 0 : i32
    return %c0_i32, %c0_i32_0 : i32, i32
  }
  func.func @transform_4(%arg0: i32, %arg1: i32) -> (i32, i32) {
    %c0_i32 = arith.constant 0 : i32
    %c0_i32_0 = arith.constant 0 : i32
    %c0_i32_1 = arith.constant 0 : i32
    return %c0_i32, %c0_i32_0 : i32, i32
  }
  func.func @transform_5(%arg0: i32, %arg1: i32) -> (i32, i32) {
    %c0_i32 = arith.constant 0 : i32
    %c0_i32_0 = arith.constant 0 : i32
    %c0_i32_1 = arith.constant 0 : i32
    return %c0_i32, %c0_i32_0 : i32, i32
  }
  func.func @transform_6(%arg0: i32, %arg1: i32) -> (i32, i32) {
    %c0_i32 = arith.constant 0 : i32
    %c0_i32_0 = arith.constant 0 : i32
    %c0_i32_1 = arith.constant 0 : i32
    return %c0_i32, %c0_i32_0 : i32, i32
  }
  func.func @transform_7(%arg0: i32, %arg1: i32) -> (i32, i32) {
    %c0_i32 = arith.constant 0 : i32
    %c0_i32_0 = arith.constant 0 : i32
    %c0_i32_1 = arith.constant 0 : i32
    return %c0_i32, %c0_i32_0 : i32, i32
  }
  func.func @transform_8(%arg0: i32, %arg1: i32) -> (i32, i32) {
    %c0_i32 = arith.constant 0 : i32
    %c0_i32_0 = arith.constant 0 : i32
    %c0_i32_1 = arith.constant 0 : i32
    return %c0_i32, %c0_i32_0 : i32, i32
  }
  func.func @transform_9(%arg0: i32, %arg1: i32) -> (i32, i32) {
    %c0_i32 = arith.constant 0 : i32
    %c0_i32_0 = arith.constant 0 : i32
    %c0_i32_1 = arith.constant 0 : i32
    return %c0_i32, %c0_i32_0 : i32, i32
  }
  func.func @transform_10(%arg0: i32, %arg1: i32) -> (i32, i32) {
    %c0_i32 = arith.constant 0 : i32
    %c0_i32_0 = arith.constant 0 : i32
    %c0_i32_1 = arith.constant 0 : i32
    return %c0_i32, %c0_i32_0 : i32, i32
  }
  func.func @transform_11(%arg0: i32, %arg1: i32) -> (i32, i32) {
    %c0_i32 = arith.constant 0 : i32
    %c0_i32_0 = arith.constant 0 : i32
    %c0_i32_1 = arith.constant 0 : i32
    return %c0_i32, %c0_i32_0 : i32, i32
  }
  func.func @transform_12(%arg0: i32, %arg1: i32) -> (i32, i32) {
    %c0_i32 = arith.constant 0 : i32
    %c0_i32_0 = arith.constant 0 : i32
    %c0_i32_1 = arith.constant 0 : i32
    return %c0_i32, %c0_i32_0 : i32, i32
  }
  func.func @transform_13(%arg0: i32, %arg1: i32) -> (i32, i32) {
    %c0_i32 = arith.constant 0 : i32
    %c0_i32_0 = arith.constant 0 : i32
    %c0_i32_1 = arith.constant 0 : i32
    return %c0_i32, %c0_i32_0 : i32, i32
  }
  func.func @transform_14(%arg0: i32, %arg1: i32) -> (i32, i32) {
    %c0_i32 = arith.constant 0 : i32
    %c0_i32_0 = arith.constant 0 : i32
    %c0_i32_1 = arith.constant 0 : i32
    return %c0_i32, %c0_i32_0 : i32, i32
  }
  func.func @transform_15(%arg0: i32, %arg1: i32) -> (i32, i32) {
    %c0_i32 = arith.constant 0 : i32
    %c0_i32_0 = arith.constant 0 : i32
    %c0_i32_1 = arith.constant 0 : i32
    return %c0_i32, %c0_i32_0 : i32, i32
  }
  func.func @transform_16(%arg0: i32, %arg1: i32) -> (i32, i32, i32) {
    %c0_i32 = arith.constant 0 : i32
    %c0_i32_0 = arith.constant 0 : i32
    %c0_i32_1 = arith.constant 0 : i32
    return %arg0, %c0_i32, %c0_i32_0 : i32, i32, i32
  }
}

</mosaic_0001>

<bundles_post_ra>
// kernel: net_forward.1
= control target key start
LH: loop header
LB: loop body
LE: loop exit
PB: predicated region body
PF: predicated region fallthrough
CT: control target
= control target key end

     0   :  { %s4813_s0 = inlined_call_operand.vmem [shape: f32[4,128,6], index: 0, kind: input, shape index: {}]   ;;  %s4814_s1 = inlined_call_operand.vmem [shape: bf16[6,64], index: 1, kind: input, shape index: {}]   ;;  %s4815_s2 = inlined_call_operand.vmem [shape: f32[1,64], index: 2, kind: input, shape index: {}]   ;;  %s4816_s3 = inlined_call_operand.vmem [shape: bf16[64,128], index: 3, kind: input, shape index: {}]   ;;  %s4817_s4 = inlined_call_operand.vmem [shape: f32[1,128], index: 4, kind: input, shape index: {}]   ;;  %s4818_s5 = inlined_call_operand.hbm [shape: bf16[128,256], index: 5, kind: input, shape index: {}]   ;;  %s4819_s6 = inlined_call_operand.vmem [shape: f32[1,256], index: 6, kind: input, shape index: {}]   ;;  %s4820_s7 = inlined_call_operand.vmem [shape: bf16[256,512], index: 7, kind: input, shape index: {}]   ;;  %s4821_s8 = inlined_call_operand.vmem [shape: f32[1,512], index: 8, kind: input, shape index: {}]   ;;  %s4822_s9 = inlined_call_operand.hbm [shape: bf16[256,128], index: 9, kind: input, shape index: {}]   ;;  %s4823_s10 = inlined_call_operand.vmem [shape: f32[1,128], index: 10, kind: input, shape index: {}]   ;;  %s4824_s11 = inlined_call_operand.hbm [shape: bf16[256,128], index: 11, kind: input, shape index: {}]   ;;  %s4825_s12 = inlined_call_operand.vmem [shape: f32[1,128], index: 12, kind: input, shape index: {}]   ;;  %s4826_s13 = inlined_call_operand.hbm [shape: f32[256,128], index: 13, kind: input, shape index: {}]   ;;  %s4827_s14 = inlined_call_operand.vmem [shape: f32[1,128], index: 14, kind: input, shape index: {}]   ;;  %s4828_s15 = inlined_call_operand.vmem [shape: f32[3,128], index: 15, kind: input, shape index: {}]   ;;  %s4829_s16 = inlined_call_operand.vmem [shape: f32[4,1,128], index: 16, kind: output, shape index: {}]  }
   0x1   :  { %4839 = sst [smem:[#allocation19_spill]] %s4813_s0 }
   0x2   :  { %4840 = sst [smem:[#allocation20_spill]] %s4814_s1 }
   0x3   :  { %4841 = sst [smem:[#allocation21_spill]] %s4815_s2 }
   0x4   :  { %4842 = sst [smem:[#allocation22_spill]] %s4816_s3 }
   0x5   :  { %4843 = sst [smem:[#allocation23_spill]] %s4817_s4 }
   0x6   :  { %4844 = sst [smem:[#allocation24_spill]] %s4819_s6 }
   0x7   :  { %4845 = sst [smem:[#allocation25_spill]] %s4820_s7 }
   0x8   :  { %4846 = sst [smem:[#allocation26_spill]] %s4821_s8 }
   0x9   :  { %4847 = sst [smem:[#allocation27_spill]] %s4822_s9 }
   0xa   :  { %4848 = sst [smem:[#allocation28_spill]] %s4823_s10 }
   0xb   :  { %4849 = sst [smem:[#allocation29_spill]] %s4825_s12 }
   0xc   :  { %4850 = sst [smem:[#allocation30_spill]] %s4827_s14 }
   0xd   :  { %4851 = sst [smem:[#allocation31_spill]] %s4828_s15 }
   0xe   :  { %21 = vsyncpa [#allocation6], 0 }
   0xf   :  { %22 = vsyncpa [#allocation8], 0 }
  0x10   :  { %23 = vsyncpa [#allocation11], 0  ;;  %s4015_s21 = smov 0   ;;  %s4017_s22 = smov 0  }
  0x11   :  { %s4019_s23 = smov 0   ;;  %s4021_s24 = smov 0  }
  0x12   :  { %s4023_s25 = smov 0   ;;  %s4025_s26 = smov 0  }
  0x13   :  { %s4027_s27 = smov 0  }
  0x14 LB: > { %4852 = sst [smem:[#allocation15_spill]] %s3898_s23  ;;  %s3025_s28 = sadd.s32 4294967295, %s3914_s27   ;;  %s3914_s27 = sphi %s4027_s27, %s29_s27   ;;  %s3910_s26 = sphi %s4025_s26, %s4889_s26   ;;  %s3906_s25 = sphi %s4023_s25, %s4888_s25   ;;  %s3902_s24 = sphi %s4021_s24, %s4887_s24   ;;  %s3898_s23 = sphi %s4019_s23, %s4886_s23   ;;  %s3894_s22 = sphi %s4017_s22, %s4885_s22   ;;  %s3890_s21 = sphi %s4015_s21, %s4884_s21  }
  0x15   : > { %s38_s29 = sadd.s32 1, %s3906_s25  ;;  %s41_s30 = sadd.s32 1, %s3910_s26 }
  0x16   : > { %p39_p0 = scmp.ge.s32.totalorder %s38_s29, 2  ;;  %s50_s0 = sadd.s32 1, %s3894_s22 }
  0x17   : > { %p57_p1 = scmp.ne.s32.totalorder %s3894_s22, %s3890_s21  ;;  %p58_p2 = scmp.eq.s32.totalorder %s3914_s27, 0 }
  0x18   : > { %s4891_s29 = smov (%p39_p0, %s38_s29), 0  ;;  %s4893_s30 = smov (!%p39_p0, %s41_s30), %s3910_s26 }
  0x19   : > { %4853 = sst [smem:[#allocation16_spill]] %s4891_s29  ;;  %s46_s17 = ssub.s32 %s3906_s25, %s4891_s29 }
  0x1a   : > { %p43_p3 = scmp.ge.s32.totalorder %s4893_s30, 2  ;;  %p3027_p4 = scmp.ge.s32.totalorder %s3914_s27, 1 }
  0x1b   : > { %p4063_p5 = por %p58_p2, %p57_p1  ;;  %p415_p6 = scmp.lt.s32.totalorder %s3914_s27, 5 }
  0x1c   : > { %s4895_s30 = smov (%p43_p3, %s4893_s30), 0  ;;  %p4076_p8 = scmp.eq.s32.totalorder %s3025_s28, 0 }
  0x1d   : > { %s4854_s18 = scalar_select %p4063_p5, 1, 0 }
  0x1e   : > { %4855 = sst [smem:[#allocation17_spill]] %s4895_s30  ;;  %p4070_p7 = pnand %p3027_p4, %p415_p6 }
  0x1f   : > { %s45_s20 = ssub.s32 %s3910_s26, %s4895_s30  ;;  %s3916_s10 = smov [#allocation7]  }
  0x20   : > { %s4856_s19 = scalar_select %p4070_p7, 1, 0 }
  0x21   : > { %s4857_s29 = scalar_select %p4076_p8, 1, 0 }
  0x22   : > { %s47_s14 = sor.u32 %s46_s17, %s45_s20  ;;  %p3489_p9 = pneg %p4070_p7 }
  0x23   : > { %p48_p10 = scmp.eq.s32.totalorder %s47_s14, 0  ;;  %s461_s15 = sshll.u32 %s3916_s10, 4  ;;  %s462_s15 = int_to_ptr.vmem [resolvable:$true] %s461_s15 }
  0x24   : > { %p4084_p11 = pnand %p4076_p8, %p3489_p9  ;;  %s4860_s9 = sld [smem:[#allocation27_spill]] }
  0x25   : > { %s4089_s8 = scalar_select %p48_p10, %s3894_s22, %s50_s0  }
  0x26   : > { %p4099_p13 = pneg %p4084_p11 }
  0x27   : > { %4859 = sst [smem:[#allocation18_spill]] %s4089_s8 }
  0x2a   : > { %s3736_s6 = scalar_lea.hbm %s4860_s9, 2048 }
  0x2b   : > { %p3737_p12 = scmp.ne.s32.totalorder %s4860_s9, %s3736_s6  ;;  %p3743_p2 = scmp.lt.u32.totalorder %s3736_s6, %s4860_s9 }
  0x2d   : > { %p3739_p0 = pnand %p4099_p13, %p3737_p12 }
  0x2f   : > { %p3740_p1 = pneg %p3739_p0 }
  0x31   : > { %p3745_p3 = pnand %p3743_p2, %p3740_p1 }
  0x33   : > { %3748 = shalt.err (!%p3745_p3)
}
  0x34   : > { %s3749_s30 = scalar_lea.vmem %s462_s15, 2048  ;;  %p3757_p10 = scmp.lt.s32.totalorder %s462_s15, %s462_s15 }
  0x35   : > { %p3750_p4 = scmp.ne.s32.totalorder %s462_s15, %s3749_s30  ;;  %p3758_p8 = scmp.lt.s32.totalorder %s3749_s30, %s3749_s30 }
  0x37   : > { %p3752_p6 = pnand %p3750_p4, %p4099_p13  ;;  %p3759_p7 = por %p3758_p8, %p3757_p10 }
  0x39   : > { %p3753_p9 = pneg %p3752_p6 }
  0x3b   : > { %p3760_p5 = pnand %p3759_p7, %p3753_p9 }
  0x3d   : > { %3763 = shalt.err (!%p3760_p5)
}
  0x3e   : > { %s4837_s4 = smov 64   ;;  %s4838_s20 = smov 4  }
  0x3f   : > { %3495 = dma.hbm_to_vmem [thread:$0]  (!%p4084_p11), %s4860_s9, 2048, %s462_s15, [#allocation8], %s4837_s4, %s4837_s4, %s4838_s20  }
  0x40   : > { %s3919_s17 = smov [#allocation5]   ;;  %s3764_s8 = scalar_lea.hbm %s4818_s5, 2048 }
  0x41   : > { %s439_s10 = sshll.u32 %s3919_s17, 4  ;;  %p3765_p5 = scmp.ne.s32.totalorder %s4818_s5, %s3764_s8  ;;  %s440_s10 = int_to_ptr.vmem [resolvable:$true] %s439_s10 }
  0x42   : > { %p3771_p12 = scmp.lt.u32.totalorder %s3764_s8, %s4818_s5 }
  0x43   : > { %p3767_p7 = pnand %p3765_p5, %p4099_p13 }
  0x45   : > { %p3768_p8 = pneg %p3767_p7 }
  0x47   : > { %p3773_p0 = pnand %p3771_p12, %p3768_p8 }
  0x49   : > { %3776 = shalt.err (!%p3773_p0)
}
  0x4a   : > { %s3777_s15 = scalar_lea.vmem %s440_s10, 2048  ;;  %p3785_p4 = scmp.lt.s32.totalorder %s440_s10, %s440_s10 }
  0x4b   : > { %p3778_p1 = scmp.ne.s32.totalorder %s440_s10, %s3777_s15  ;;  %p3786_p6 = scmp.lt.s32.totalorder %s3777_s15, %s3777_s15 }
  0x4d   : > { %p3780_p2 = pnand %p3778_p1, %p4099_p13  ;;  %p3787_p9 = por %p3786_p6, %p3785_p4 }
  0x4f   : > { %p3781_p3 = pneg %p3780_p2 }
  0x51   : > { %p3788_p10 = pnand %p3787_p9, %p3781_p3 }
  0x53   : > { %3791 = shalt.err (!%p3788_p10)
}
  0x54   : > { %s3920_s2 = smov 128   ;;  %s3921_s7 = smov 8  }
  0x55   : > { %3492 = dma.hbm_to_vmem [thread:$0]  (!%p4084_p11), %s4818_s5, 2048, %s440_s10, [#allocation6], %s3920_s2, %s3920_s2, %s3921_s7  }
  0x56   : > { %s3922_s8 = smov [#allocation9]   ;;  %s3923_s28 = smov [#allocation10]  }
  0x57   : > { %s477_s6 = sshll.u32 %s3922_s8, 4  ;;  %s493_s17 = sshll.u32 %s3923_s28, 4  ;;  %s478_s6 = int_to_ptr.vmem [resolvable:$true] %s477_s6  ;;  %s494_s17 = int_to_ptr.vmem [resolvable:$true] %s493_s17 }
  0x58   : > { %s3792_s15 = scalar_lea.hbm %s4824_s11, 2048 }
  0x59   : > { %p3793_p5 = scmp.ne.s32.totalorder %s4824_s11, %s3792_s15  ;;  %p3799_p12 = scmp.lt.u32.totalorder %s3792_s15, %s4824_s11 }
  0x5b   : > { %p3795_p7 = pnand %p3793_p5, %p4099_p13 }
  0x5d   : > { %p3796_p8 = pneg %p3795_p7 }
  0x5f   : > { %p3801_p0 = pnand %p3799_p12, %p3796_p8 }
  0x61   : > { %3804 = shalt.err (!%p3801_p0)
}
  0x62   : > { %s3805_s10 = scalar_lea.vmem %s478_s6, 2048  ;;  %p3813_p4 = scmp.lt.s32.totalorder %s478_s6, %s478_s6 }
  0x63   : > { %p3806_p1 = scmp.ne.s32.totalorder %s478_s6, %s3805_s10  ;;  %p3814_p6 = scmp.lt.s32.totalorder %s3805_s10, %s3805_s10 }
  0x65   : > { %p3808_p2 = pnand %p3806_p1, %p4099_p13  ;;  %p3815_p9 = por %p3814_p6, %p3813_p4 }
  0x67   : > { %p3809_p3 = pneg %p3808_p2 }
  0x69   : > { %p3816_p10 = pnand %p3815_p9, %p3809_p3 }
  0x6b   : > { %3819 = shalt.err (!%p3816_p10)
}
  0x6c   : > { %s4862_s4 = smov 4   ;;  %s4863_s20 = smov 64  }
  0x6d   : > { %3498 = dma.hbm_to_vmem [thread:$0]  (!%p4084_p11), %s4824_s11, 2048, %s478_s6, [#allocation8], %s4863_s20, %s4863_s20, %s4862_s4  }
  0x6e   : > { %s3820_s8 = scalar_lea.hbm %s4826_s13, 4096 }
  0x6f   : > { %p3821_p5 = scmp.ne.s32.totalorder %s4826_s13, %s3820_s8  ;;  %p3827_p12 = scmp.lt.u32.totalorder %s3820_s8, %s4826_s13 }
  0x71   : > { %p3823_p7 = pnand %p3821_p5, %p4099_p13 }
  0x73   : > { %p3824_p8 = pneg %p3823_p7 }
  0x75   : > { %p3829_p0 = pnand %p3827_p12, %p3824_p8 }
  0x77   : > { %3832 = shalt.err (!%p3829_p0)
}
  0x78   : > { %s3833_s10 = scalar_lea.vmem %s494_s17, 4096  ;;  %p3841_p4 = scmp.lt.s32.totalorder %s494_s17, %s494_s17 }
  0x79   : > { %p3834_p1 = scmp.ne.s32.totalorder %s494_s17, %s3833_s10  ;;  %p3842_p6 = scmp.lt.s32.totalorder %s3833_s10, %s3833_s10 }
  0x7b   : > { %p3836_p2 = pnand %p3834_p1, %p4099_p13  ;;  %p3843_p9 = por %p3842_p6, %p3841_p4 }
  0x7d   : > { %p3837_p3 = pneg %p3836_p2 }
  0x7f   : > { %p3844_p10 = pnand %p3843_p9, %p3837_p3 }
  0x81   : > { %3847 = shalt.err (!%p3844_p10)
}
  0x82   : > { %3501 = dma.hbm_to_vmem [thread:$0]  (!%p4084_p11), %s4826_s13, 4096, %s494_s17, [#allocation11], %s3920_s2, %s3920_s2, %s3921_s7  }
  0x83   : > { %p3032_p5 = scmp.ge.s32.totalorder %s3914_s27, 4 }
  0x84   : > { %p4864_p13 = scmp.ne.s32.totalorder (!%p3032_p5), %s4854_s18, 0 }
  0x85   : > { %509 = sbr.rel (%p3032_p5) target bundleno = 158 (0x9e), region = 76 }
  0x8c   : > { %512 = sbr.rel (!%p4864_p13) target bundleno = 158 (0x9e), region = 80  ;;  %s514_s14 = sand.u32 (%p4864_p13), 1, %s3894_s22  }
  0x8d   : > { %s3035_s20 = sshll.u32 (%p4864_p13), %s3906_s25, 3  ;;  %s3033_s9 = sshll.u32 (%p4864_p13), %s514_s14, 7 }
  0x8e   : > { %s3190_s12 = sshll.u32 (%p4864_p13), %s3910_s26, 5  ;;  %s4865_s28 = sld [smem:[#allocation19_spill]] (%p4864_p13) }
  0x8f   : > { %s520_s23 = sadd.s32 (%p4864_p13), %s3190_s12, %s3035_s20  ;;  %s516_s18 = scalar_lea.vmem (%p4864_p13), [#allocation4], %s3033_s9 }
  0x90   : > { %s3037_s1 = sshll.u32 (%p4864_p13), %s520_s23, 3 }
  0x94   : > { %s4190_s0 = scalar_lea.vmem %s4865_s28, %s3037_s1 }
  0x95   : > { %v580_v0 = vld [vmem:[%s4190_s0] sm:$0xff]  ;;  %v582_v1 = vld [vmem:[%s4190_s0 + $0x8] sm:$0xff]  ;;  %v584_v2 = vld [vmem:[%s4190_s0 + $0x10] sm:$0xff] }
  0x96   : > { %581 = vst [vmem:[%s516_s18] sm:$0xff] %v580_v0  ;;  %583 = vst [vmem:[%s516_s18 + $0x8] sm:$0xff] %v582_v1  ;;  %v586_v3 = vld [vmem:[%s4190_s0 + $0x18] sm:$0xff]  ;;  %v588_v4 = vld [vmem:[%s4190_s0 + $0x20] sm:$0xff] }
  0x97   : > { %585 = vst [vmem:[%s516_s18 + $0x10] sm:$0xff] %v584_v2  ;;  %v590_v5 = vld [vmem:[%s4190_s0 + $0x28] sm:$0xff]  ;;  %587 = vst [vmem:[%s516_s18 + $0x18] sm:$0xff] %v586_v3  ;;  %v592_v6 = vld [vmem:[%s4190_s0 + $0x30] sm:$0xff] }
  0x98   : > { %589 = vst [vmem:[%s516_s18 + $0x20] sm:$0xff] %v588_v4  ;;  %591 = vst [vmem:[%s516_s18 + $0x28] sm:$0xff] %v590_v5  ;;  %v594_v7 = vld [vmem:[%s4190_s0 + $0x38] sm:$0xff]  ;;  %v596_v8 = vld [vmem:[%s4190_s0 + $0x80] sm:$0xff] }
  0x99   : > { %593 = vst [vmem:[%s516_s18 + $0x30] sm:$0xff] %v592_v6  ;;  %595 = vst [vmem:[%s516_s18 + $0x38] sm:$0xff] %v594_v7  ;;  %v598_v9 = vld [vmem:[%s4190_s0 + $0x88] sm:$0xff]  ;;  %v600_v10 = vld [vmem:[%s4190_s0 + $0x90] sm:$0xff] }
  0x9a   : > { %597 = vst [vmem:[%s516_s18 + $0x40] sm:$0xff] %v596_v8  ;;  %v602_v11 = vld [vmem:[%s4190_s0 + $0x98] sm:$0xff]  ;;  %599 = vst [vmem:[%s516_s18 + $0x48] sm:$0xff] %v598_v9  ;;  %v604_v12 = vld [vmem:[%s4190_s0 + $0xa0] sm:$0xff] }
  0x9b   : > { %601 = vst [vmem:[%s516_s18 + $0x50] sm:$0xff] %v600_v10  ;;  %603 = vst [vmem:[%s516_s18 + $0x58] sm:$0xff] %v602_v11  ;;  %v606_v13 = vld [vmem:[%s4190_s0 + $0xa8] sm:$0xff]  ;;  %v608_v14 = vld [vmem:[%s4190_s0 + $0xb0] sm:$0xff] }
  0x9c   : > { %605 = vst [vmem:[%s516_s18 + $0x60] sm:$0xff] %v604_v12  ;;  %607 = vst [vmem:[%s516_s18 + $0x68] sm:$0xff] %v606_v13  ;;  %v610_v15 = vld [vmem:[%s4190_s0 + $0xb8] sm:$0xff] }
  0x9d   : > { %609 = vst [vmem:[%s516_s18 + $0x70] sm:$0xff] %v608_v14  ;;  %611 = vst [vmem:[%s516_s18 + $0x78] sm:$0xff] %v610_v15 }
  0x9e PF: > { %p4866_p11 = scmp.ne.s32.totalorder %s4856_s19, 0 }
  0x9f   : > { %s623_s2 = sand.u32 (!%p4866_p11), 1, %s3890_s21   ;;  %p4867_p7 = scmp.ne.s32.totalorder (!%p4866_p11), %s4857_s29, 0 }
  0xa0   : > { %620 = sbr.rel (%p4866_p11) target bundleno = 1630 (0x65e), region = 118  ;;  %s3039_s7 = sshll.u32 (!%p4866_p11), %s623_s2, 7 }
  0xa1   : > { %s4211_s17 = scalar_lea.vmem (!%p4866_p11), [#allocation4], %s3039_s7 }
  0xa7   : > { %3877 = dma.done.wait (%p4867_p7), [#allocation6], 2048  }
  0xa8   : > { %3879 = vsyncadd (%p4867_p7), [#allocation6], 4294965248 }
  0xa9   : > { %3881 = dma.done.wait (%p4867_p7), [#allocation8], 4096  }
  0xaa   : > { %3883 = vsyncadd (%p4867_p7), [#allocation8], 4294963200 }
  0xab   : > { %3885 = dma.done.wait (%p4867_p7), [#allocation11], 4096  }
  0xac   : > { %3887 = vsyncadd (%p4867_p7), [#allocation11], 4294963200  ;;  %s3044_s21 = sshll.u32 %s3902_s24, 1  ;;  %s4868_s10 = sld [smem:[#allocation15_spill]] }
  0xad   : > { %p690_p8 = scmp.lt.s32.totalorder %s3044_s21, 3 }
  0xaf   : > { %s4897_s21 = smov (!%p690_p8, %s3044_s21), 3 }
  0xb0   : > { %s4229_s15 = scalar_lea.vmem %s4829_s16, %s4897_s21 }
  0xb2   : > { %p3045_p12 = scmp.ne.s32.totalorder %s4868_s10, 0 }
  0xb3   : > { %v3924_v16 = vmov (!%p3045_p12), 0.0  }
  0xb4   : > { %698 = sbr.rel (%p3045_p12) target bundleno = 187 (0xbb), region = 142  ;;  %699 = vst [vmem:[#allocation2] sm:$0xf] (!%p3045_p12), %v3924_v16  ;;  %700 = vst [vmem:[#allocation3] sm:$0x3] (!%p3045_p12), %v3924_v16 }
  0xbb PF: > { %s4869_s29 = sld [smem:[#allocation20_spill]]  ;;  %vm758_vm0 = vcmask 1042432   ;;  %v701_v18 = vld [vmem:[%s4211_s17] sm:$0xff]  ;;  %v702_v19 = vld [vmem:[%s4211_s17 + $0x8] sm:$0xff]  ;;  %vm733_vm1 = vcmask 48128   ;;  %v703_v21 = vld [vmem:[%s4211_s17 + $0x10] sm:$0xff] }
  0xbc   : > { %v704_v22 = vld [vmem:[%s4211_s17 + $0x18] sm:$0xff]  ;;  %v717_v23 = vpack.c.bf16 %v702_v19, %v701_v18  ;;  %vm2633_vm2 = vcmask 23552   ;;  %v705_v24 = vld [vmem:[%s4211_s17 + $0x20] sm:$0xff]  ;;  %v706_v28 = vld [vmem:[%s4211_s17 + $0x28] sm:$0xff]  ;;  %s4870_s20 = sld [smem:[#allocation22_spill]]  ;;  %s4871_s18 = sld [smem:[#allocation21_spill]] }
  0xbd   : > { %v2634_v25 = vsel %vm2633_vm2, %v701_v18, 0.0  ;;  %v2635_v26 = vsel %vm2633_vm2, %v702_v19, 0.0  ;;  %v2637_v27 = vsel %vm2633_vm2, %v703_v21, 0.0  ;;  %v718_v30 = vpack.c.bf16 %v704_v22, %v703_v21  ;;  %v707_v33 = vld [vmem:[%s4211_s17 + $0x30] sm:$0xff]  ;;  %v709_v34 = vld [vmem:[%s4211_s17 + $0x40] sm:$0xff]  ;;  %v710_v35 = vld [vmem:[%s4211_s17 + $0x48] sm:$0xff] }
  0xbe   : > { %3379 = vmatprep.mubr.msk.bf16.mxu0 %vm733_vm1, %v717_v23  ;;  %v2636_v29 = vadd.f32 %v2635_v26, %v2634_v25  ;;  %v719_v31 = vpack.c.bf16 %v706_v28, %v705_v24  ;;  %v2639_v32 = vsel %vm2633_vm2, %v704_v22, 0.0  ;;  %v2641_v37 = vsel %vm2633_vm2, %v705_v24, 0.0  ;;  %v708_v38 = vld [vmem:[%s4211_s17 + $0x38] sm:$0xff]  ;;  %v711_v41 = vld [vmem:[%s4211_s17 + $0x50] sm:$0xff]  ;;  %v713_v45 = vld [vmem:[%s4211_s17 + $0x60] sm:$0xff]  ;;  %s4873_s2 = sld [smem:[#allocation23_spill]] }
  0xbf   : > { %v2655_v39 = vsel %vm2633_vm2, %v709_v34, 0.0  ;;  %v2656_v40 = vsel %vm2633_vm2, %v710_v35, 0.0  ;;  %v712_v42 = vld [vmem:[%s4211_s17 + $0x58] sm:$0xff]  ;;  %v2658_v44 = vsel %vm2633_vm2, %v711_v41, 0.0  ;;  %v2643_v47 = vsel %vm2633_vm2, %v706_v28, 0.0  ;;  %v714_v52 = vld [vmem:[%s4211_s17 + $0x68] sm:$0xff] }
  0xc0   : > { %v2638_v36 = vadd.f32 %v2637_v27, %v2636_v29  ;;  %v2657_v43 = vadd.f32 %v2656_v40, %v2655_v39  ;;  %v2660_v48 = vsel %vm2633_vm2, %v712_v42, 0.0  ;;  %v2662_v53 = vsel %vm2633_vm2, %v713_v45, 0.0  ;;  %v715_v59 = vld [vmem:[%s4211_s17 + $0x70] sm:$0xff]  ;;  %v716_v0 = vld [vmem:[%s4211_s17 + $0x78] sm:$0xff]  ;;  %v3584_v13 = vld [vmem:[#allocation5] ss:$8 sps:$4 sm:$0xff]  }
  0xc1   : > { %v725_v17 = vld [vmem:[%s4869_s29] sm:$0x7]  ;;  %v720_v55 = vpack.c.bf16 %v708_v38, %v707_v33  ;;  %v2645_v56 = vsel %vm2633_vm2, %v707_v33, 0.0  ;;  %v721_v57 = vpack.c.bf16 %v710_v35, %v709_v34  ;;  %v2664_v61 = vsel %vm2633_vm2, %v714_v52, 0.0  ;;  %v3586_v14 = vld [vmem:[#allocation5 + $0x4] ss:$8 sps:$4 sm:$0xff]  }
  0xc2   : > { %3472 = vmatprep.subr.msk.bf16.mxu0 %vm758_vm0, %v725_v17  ;;  %v760_v20 = vsel %vm758_vm0, %v725_v17, 0  ;;  %v2640_v46 = vadd.f32 %v2639_v32, %v2638_v36  ;;  %v3580_v49 = vld [vmem:[%s4870_s20] sm:$0xff]   ;;  %v3581_v50 = vld [vmem:[%s4870_s20 + $0x8] sm:$0xff]   ;;  %v2659_v51 = vadd.f32 %v2658_v44, %v2657_v43  ;;  %v2647_v62 = vsel %vm2633_vm2, %v708_v38, 0.0  ;;  %v3582_v11 = vld [vmem:[%s4870_s20 + $0x10] sm:$0xff]   ;;  %s4872_s17 = sld [smem:[#allocation25_spill]] }
  0xc3   : > { %3378 = vmatpush3.bf16.msra.mxu0 %v760_v20  ;;  %3395 = vmatprep.subr.bf16.mxu1 %v3580_v49  ;;  %v2666_v2 = vsel %vm2633_vm2, %v715_v59, 0.0  ;;  %v2668_v5 = vsel %vm2633_vm2, %v716_v0, 0.0  ;;  %v722_v7 = vpack.c.bf16 %v712_v42, %v711_v41  ;;  %v723_v8 = vpack.c.bf16 %v714_v52, %v713_v45  ;;  %v3583_v12 = vld [vmem:[%s4870_s20 + $0x18] sm:$0xff]   ;;  %v3592_v17 = vld [vmem:[#allocation5 + $0x24] ss:$8 sps:$4 sm:$0xff]   ;;  %s4874_s23 = sld [smem:[#allocation24_spill]] }
  0xc4   : > { %v2642_v54 = vadd.f32 %v2641_v37, %v2640_v46  ;;  %v2661_v58 = vadd.f32 %v2660_v48, %v2659_v51  ;;  %3396 = vmatpush3.bf16.msra.mxu1 %v3580_v49  ;;  %v724_v10 = vpack.c.bf16 %v716_v0, %v715_v59  ;;  %v3589_v15 = vld [vmem:[#allocation5 + $0x14] ss:$8 sps:$4 sm:$0xff]   ;;  %1176 = vmatprep.subr.bf16.mxu0 %v3586_v14  ;;  %v3587_v16 = vld [vmem:[#allocation5 + $0x10] ss:$8 sps:$4 sm:$0xff]   ;;  %v3590_v18 = vld [vmem:[#allocation5 + $0x20] ss:$8 sps:$4 sm:$0xff]  }
  0xc5   : > { %3397 = vmatprep.subr.bf16.mxu1 %v3581_v50  ;;  %v3595_v19 = vld [vmem:[#allocation5 + $0x34] ss:$8 sps:$4 sm:$0xff]   ;;  %v3593_v20 = vld [vmem:[#allocation5 + $0x30] ss:$8 sps:$4 sm:$0xff]   ;;  %v3598_v21 = vld [vmem:[#allocation5 + $0x44] ss:$8 sps:$4 sm:$0xff]  }
  0xc6   : > { %3380 = vmatmul.mubr.msk.bf16.vlgmr.msra.gmra.mrb[0].mxu0 %vm733_vm1, %v718_v30  ;;  %v2644_v60 = vadd.f32 %v2643_v47, %v2642_v54  ;;  %v2663_v63 = vadd.f32 %v2662_v53, %v2661_v58  ;;  %v3596_v22 = vld [vmem:[#allocation5 + $0x40] ss:$8 sps:$4 sm:$0xff]   ;;  %v3601_v23 = vld [vmem:[#allocation5 + $0x54] ss:$8 sps:$4 sm:$0xff]   ;;  %v3599_v24 = vld [vmem:[#allocation5 + $0x50] ss:$8 sps:$4 sm:$0xff]  }
  0xc7   : > { %3383 = vmatprep.mubr.msk.bf16.mxu0 %vm733_vm1, %v719_v31  ;;  %1177 = vmatpush1.bf16.msra.mxu0 %v3584_v13  ;;  %v3046_v25 = vld [vmem:[%s4871_s18] ss:$0 sm:$0xff]  ;;  %vm922_vm3 = vcmask 523264   ;;  %vm2616_vm4 = vcmask 1041409   ;;  %s4875_s8 = sld [smem:[#allocation26_spill]]  ;;  %s4876_s18 = sld [smem:[#allocation31_spill]] }
  0xc8   : > { %v2646_v1 = vadd.f32 %v2645_v56, %v2644_v60  ;;  %v2665_v3 = vadd.f32 %v2664_v61, %v2663_v63  ;;  %3398 = vmatpush3.bf16.msra.mxu1 %v3581_v50  ;;  %1178 = vmatprep.subr.bf16.mxu0 %v3589_v15  ;;  %vm3927_vm5 = vmmov 0   ;;  %s4877_s21 = sld [smem:[#allocation28_spill]]  ;;  %s4878_s10 = sld [smem:[#allocation29_spill]] }
  0xc9   : > { %3399 = vmatprep.subr.bf16.mxu1 %v3582_v11  ;;  %s4879_s6 = sld [smem:[#allocation15_spill]] }
  0xca   : > { %v4279_v4 = vadd.f32 %v2647_v62, %v2646_v1  ;;  %v2667_v6 = vadd.f32 %v2666_v2, %v2665_v3 }
  0xcb   : > { %1179 = vmatpush1.bf16.msra.mxu0 %v3587_v16 }
  0xcc   : > { %v4282_v9 = vadd.f32 %v2668_v5, %v2667_v6  ;;  %3400 = vmatpush3.bf16.msra.mxu1 %v3582_v11  ;;  %1180 = vmatprep.subr.bf16.mxu0 %v3592_v17 }
  0xcd   : > { %3401 = vmatprep.subr.bf16.mxu1 %v3583_v12 }
  0xce   : > { %3384 = vmatmul.mubr.msk.bf16.gmra.mrb[4].mxu0 %vm733_vm1, %v720_v55 }
  0xcf   : > { %3387 = vmatprep.mubr.msk.bf16.mxu0 %vm733_vm1, %v721_v57  ;;  %1181 = vmatpush1.bf16.msra.mxu0 %v3590_v18  ;;  %p3184_p0 = scmp.ne.s32.totalorder %s4879_s6, 1 }
  0xd0   : > { %3402 = vmatpush3.bf16.msra.mxu1 %v3583_v12  ;;  %1182 = vmatprep.subr.bf16.mxu0 %v3595_v19  ;;  %s4880_s24 = sld [smem:[#allocation30_spill]] (!%p3184_p0) }
  0xd3   : > { %1183 = vmatpush1.bf16.msra.mxu0 %v3593_v20  ;;  %v3604_v20 = vld [vmem:[#allocation5 + $0x64] ss:$8 sps:$4 sm:$0xff]  }
  0xd4   : > { %1184 = vmatprep.subr.bf16.mxu0 %v3598_v21  ;;  %v3602_v21 = vld [vmem:[#allocation5 + $0x60] ss:$8 sps:$4 sm:$0xff]  }
  0xd6   : > { %3388 = vmatmul.mubr.msk.bf16.gmra.mrb[8].mxu0 %vm733_vm1, %v722_v7 }
  0xd7   : > { %3391 = vmatprep.mubr.msk.bf16.mxu0 %vm733_vm1, %v723_v8  ;;  %1185 = vmatpush1.bf16.msra.mxu0 %v3596_v22  ;;  %v3607_v22 = vld [vmem:[#allocation5 + $0x74] ss:$8 sps:$4 sm:$0xff]  }
  0xd8   : > { %1186 = vmatprep.subr.bf16.mxu0 %v3601_v23  ;;  %v3605_v23 = vld [vmem:[#allocation5 + $0x70] ss:$8 sps:$4 sm:$0xff]  }
  0xdb   : > { %1187 = vmatpush1.bf16.msra.mxu0 %v3599_v24  ;;  %v3925_v24 = vmov 0  }
  0xdc   : > { %1188 = vmatprep.subr.bf16.mxu0 %v3604_v20  ;;  %v3625_v20 = vld [vmem:[%s4872_s17 + $0x4c] ss:$16 sps:$4 sm:$0xff]  }
  0xde   : > { %3392 = vmatmul.mubr.msk.bf16.gmra.mrb[12].mxu0 %vm733_vm1, %v724_v10 }
  0xdf   : > { %1189 = vmatpush1.bf16.msra.mxu0 %v3602_v21  ;;  %1208 = vmatprep.mubr.bf16.mxu0 %v3925_v24 }
  0xe0   : > { %1190 = vmatprep.subr.bf16.mxu0 %v3607_v22 }
  0xe3   : > { %1191 = vmatpush1.bf16.msra.mxu0 %v3605_v23 }
 0x199   : > { %v3381_v26 = vpop.f32.mrb[0].mxu0 }
 0x19a   : > { %v805_v27 = vadd.f32 %v3381_v26, %v3046_v25  ;;  %v796_v28 = vpop.f32.mrb[1].mxu0  ;;  %v3610_v26 = vld [vmem:[%s4872_s17 + $0x4] ss:$16 sps:$4 sm:$0xff]  }
 0x19b   : > { %v797_v29 = vadd.f32 %v3046_v25, %v796_v28  ;;  %v3382_v30 = vpop.f32.mrb[2].mxu0  ;;  %v3616_v28 = vld [vmem:[%s4872_s17 + $0x24] ss:$16 sps:$4 sm:$0xff]   ;;  %1743 = vmatprep.subr.bf16.mxu1 %v3610_v26 }
 0x19c   : > { %v808_v31 = vadd.f32 %v3382_v30, %v3046_v25  ;;  %v799_v32 = vpop.f32.mrb[3].mxu0  ;;  %v861_v34 = vmax.f32 %v805_v27, 0.0  ;;  %v3613_v27 = vld [vmem:[%s4872_s17 + $0xc] ss:$16 sps:$4 sm:$0xff]   ;;  %v3622_v30 = vld [vmem:[%s4872_s17 + $0x44] ss:$16 sps:$4 sm:$0xff]  }
 0x19d   : > { %v800_v33 = vadd.f32 %v3046_v25, %v799_v32  ;;  %v859_v36 = vmax.f32 %v797_v29, 0.0  ;;  %1856 = vmatprep.subr.bf16.mxu0 %v3613_v27  ;;  %v3614_v29 = vld [vmem:[%s4872_s17 + $0x20] ss:$16 sps:$4 sm:$0xff]   ;;  %v3628_v32 = vld [vmem:[%s4872_s17 + $0x64] ss:$16 sps:$4 sm:$0xff]  }
 0x19e   : > { %v862_v35 = vmax.f32 %v808_v31, 0.0  ;;  %v3620_v31 = vld [vmem:[%s4872_s17 + $0x40] ss:$16 sps:$4 sm:$0xff]  }
 0x19f   : > { %v860_v37 = vmax.f32 %v800_v33, 0.0  ;;  %v3626_v33 = vld [vmem:[%s4872_s17 + $0x60] ss:$16 sps:$4 sm:$0xff]  }
 0x1a0   : > { %v876_v38 = vpack.c.bf16 %v862_v35, %v861_v34  ;;  %v3634_v34 = vld [vmem:[%s4872_s17 + $0x84] ss:$16 sps:$4 sm:$0xff]   ;;  %v3632_v35 = vld [vmem:[%s4872_s17 + $0x80] ss:$16 sps:$4 sm:$0xff]  }
 0x1a1   : > { %v3385_v39 = vpop.f32.mrb[4].mxu0  ;;  %v875_v40 = vpack.c.bf16 %v860_v37, %v859_v36  ;;  %v3640_v36 = vld [vmem:[%s4872_s17 + $0xa4] ss:$16 sps:$4 sm:$0xff]   ;;  %v3638_v37 = vld [vmem:[%s4872_s17 + $0xa0] ss:$16 sps:$4 sm:$0xff]  }
 0x1a2   : > { %v821_v41 = vadd.f32 %v3385_v39, %v3046_v25  ;;  %v812_v42 = vpop.f32.mrb[5].mxu0  ;;  %v3644_v39 = vld [vmem:[%s4872_s17 + $0xc0] ss:$16 sps:$4 sm:$0xff]  }
 0x1a3   : > { %v813_v43 = vadd.f32 %v3046_v25, %v812_v42  ;;  %3403 = vmatprep.mubr.msk.bf16.mxu1 %vm922_vm3, %v875_v40  ;;  %v3386_v44 = vpop.f32.mrb[6].mxu0  ;;  %v3652_v40 = vld [vmem:[%s4872_s17 + $0xe4] ss:$16 sps:$4 sm:$0xff]  }
 0x1a4   : > { %v865_v45 = vmax.f32 %v821_v41, 0.0  ;;  %v824_v46 = vadd.f32 %v3386_v44, %v3046_v25  ;;  %3404 = vmatmul.mubr.msk.bf16.vlgmr.msra.gmra.mrb[0].mxu1 %vm922_vm3, %v876_v38  ;;  %v815_v47 = vpop.f32.mrb[7].mxu0  ;;  %v3646_v38 = vld [vmem:[%s4872_s17 + $0xc4] ss:$16 sps:$4 sm:$0xff]   ;;  %v3650_v41 = vld [vmem:[%s4872_s17 + $0xe0] ss:$16 sps:$4 sm:$0xff]  }
 0x1a5   : > { %v863_v48 = vmax.f32 %v813_v43, 0.0  ;;  %v816_v49 = vadd.f32 %v3046_v25, %v815_v47  ;;  %v3658_v42 = vld [vmem:[%s4872_s17 + $0x104] ss:$16 sps:$4 sm:$0xff]   ;;  %v3656_v43 = vld [vmem:[%s4872_s17 + $0x100] ss:$16 sps:$4 sm:$0xff]  }
 0x1a6   : > { %v866_v50 = vmax.f32 %v824_v46, 0.0  ;;  %v3664_v44 = vld [vmem:[%s4872_s17 + $0x124] ss:$16 sps:$4 sm:$0xff]   ;;  %v3668_v47 = vld [vmem:[%s4872_s17 + $0x140] ss:$16 sps:$4 sm:$0xff]  }
 0x1a7   : > { %v864_v51 = vmax.f32 %v816_v49, 0.0  ;;  %v3670_v46 = vld [vmem:[%s4872_s17 + $0x144] ss:$16 sps:$4 sm:$0xff]   ;;  %v3674_v49 = vld [vmem:[%s4872_s17 + $0x160] ss:$16 sps:$4 sm:$0xff]  }
 0x1a8   : > { %v878_v52 = vpack.c.bf16 %v866_v50, %v865_v45  ;;  %v3662_v45 = vld [vmem:[%s4872_s17 + $0x120] ss:$16 sps:$4 sm:$0xff]   ;;  %v3682_v50 = vld [vmem:[%s4872_s17 + $0x184] ss:$16 sps:$4 sm:$0xff]  }
 0x1a9   : > { %v877_v53 = vpack.c.bf16 %v864_v51, %v863_v48  ;;  %v3389_v54 = vpop.f32.mrb[8].mxu0  ;;  %v3676_v48 = vld [vmem:[%s4872_s17 + $0x164] ss:$16 sps:$4 sm:$0xff]   ;;  %v3680_v51 = vld [vmem:[%s4872_s17 + $0x180] ss:$16 sps:$4 sm:$0xff]  }
 0x1aa   : > { %v837_v55 = vadd.f32 %v3389_v54, %v3046_v25  ;;  %v828_v56 = vpop.f32.mrb[9].mxu0  ;;  %v4395_v54 = vld [vmem:[%s4873_s2] ss:$0 sm:$0xff] }
 0x1ab   : > { %3407 = vmatprep.mubr.msk.bf16.mxu1 %vm922_vm3, %v877_v53  ;;  %v829_v57 = vadd.f32 %v3046_v25, %v828_v56  ;;  %v3390_v58 = vpop.f32.mrb[10].mxu0  ;;  %v3686_v53 = vld [vmem:[%s4872_s17 + $0x1a0] ss:$16 sps:$4 sm:$0xff]  }
 0x1ac   : > { %3408 = vmatmul.mubr.msk.bf16.gmra.mrb[4].mxu1 %vm922_vm3, %v878_v52  ;;  %v869_v59 = vmax.f32 %v837_v55, 0.0  ;;  %v840_v60 = vadd.f32 %v3390_v58, %v3046_v25  ;;  %v831_v61 = vpop.f32.mrb[11].mxu0  ;;  %v3688_v52 = vld [vmem:[%s4872_s17 + $0x1a4] ss:$16 sps:$4 sm:$0xff]  }
 0x1ad   : > { %v867_v62 = vmax.f32 %v829_v57, 0.0  ;;  %v832_v63 = vadd.f32 %v3046_v25, %v831_v61 }
 0x1ae   : > { %v870_v0 = vmax.f32 %v840_v60, 0.0 }
 0x1af   : > { %v868_v1 = vmax.f32 %v832_v63, 0.0 }
 0x1b0   : > { %v880_v2 = vpack.c.bf16 %v870_v0, %v869_v59 }
 0x1b1   : > { %v879_v3 = vpack.c.bf16 %v868_v1, %v867_v62  ;;  %v3393_v5 = vpop.f32.mrb[12].mxu0 }
 0x1b2   : > { %v853_v6 = vadd.f32 %v3393_v5, %v3046_v25  ;;  %v844_v7 = vpop.f32.mrb[13].mxu0  ;;  %v3611_v5 = vld [vmem:[%s4872_s17 + $0x8] ss:$16 sps:$4 sm:$0xff]  }
 0x1b3   : > { %3411 = vmatprep.mubr.msk.bf16.mxu1 %vm922_vm3, %v879_v3  ;;  %v845_v8 = vadd.f32 %v3046_v25, %v844_v7  ;;  %v3394_v10 = vpop.f32.mrb[14].mxu0 }
 0x1b4   : > { %3412 = vmatmul.mubr.msk.bf16.gmra.mrb[8].mxu1 %vm922_vm3, %v880_v2  ;;  %v873_v11 = vmax.f32 %v853_v6, 0.0  ;;  %v856_v12 = vadd.f32 %v3394_v10, %v3046_v25  ;;  %v847_v13 = vpop.f32.mrb[15].mxu0 }
 0x1b5   : > { %v871_v14 = vmax.f32 %v845_v8, 0.0  ;;  %v848_v15 = vadd.f32 %v3046_v25, %v847_v13  ;;  %v3608_v25 = vld [vmem:[%s4872_s17] ss:$16 sps:$4 sm:$0xff]   ;;  %v3619_v8 = vld [vmem:[%s4872_s17 + $0x2c] ss:$16 sps:$4 sm:$0xff]  }
 0x1b6   : > { %v874_v16 = vmax.f32 %v856_v12, 0.0  ;;  %1744 = vmatpush1.bf16.msra.mxu1 %v3608_v25  ;;  %v3623_v25 = vld [vmem:[%s4872_s17 + $0x48] ss:$16 sps:$4 sm:$0xff]  }
 0x1b7   : > { %v872_v17 = vmax.f32 %v848_v15, 0.0  ;;  %1745 = vmatprep.subr.bf16.mxu1 %v3616_v28  ;;  %v3631_v28 = vld [vmem:[%s4872_s17 + $0x6c] ss:$16 sps:$4 sm:$0xff]  }
 0x1b8   : > { %v882_v18 = vpack.c.bf16 %v874_v16, %v873_v11 }
 0x1b9   : > { %v881_v19 = vpack.c.bf16 %v872_v17, %v871_v14  ;;  %v3617_v17 = vld [vmem:[%s4872_s17 + $0x28] ss:$16 sps:$4 sm:$0xff]  }
 0x1ba   : > { %1746 = vmatpush1.bf16.msra.mxu1 %v3614_v29 }
 0x1bb   : > { %3415 = vmatprep.mubr.msk.bf16.mxu1 %vm922_vm3, %v881_v19  ;;  %1747 = vmatprep.subr.bf16.mxu1 %v3622_v30 }
 0x1bc   : > { %3416 = vmatmul.mubr.msk.bf16.gmra.mrb[12].mxu1 %vm922_vm3, %v882_v18 }
 0x1be   : > { %1748 = vmatpush1.bf16.msra.mxu1 %v3620_v31 }
 0x1bf   : > { %1749 = vmatprep.subr.bf16.mxu1 %v3628_v32 }
 0x1c2   : > { %1750 = vmatpush1.bf16.msra.mxu1 %v3626_v33 }
 0x1c3   : > { %1751 = vmatprep.subr.bf16.mxu1 %v3634_v34 }
 0x1c6   : > { %1752 = vmatpush1.bf16.msra.mxu1 %v3632_v35 }
 0x1c7   : > { %1753 = vmatprep.subr.bf16.mxu1 %v3640_v36  ;;  %v3629_v36 = vld [vmem:[%s4872_s17 + $0x68] ss:$16 sps:$4 sm:$0xff]  }
 0x1ca   : > { %1754 = vmatpush1.bf16.msra.mxu1 %v3638_v37 }
 0x1cb   : > { %1755 = vmatprep.subr.bf16.mxu1 %v3646_v38 }
 0x1ce   : > { %1756 = vmatpush1.bf16.msra.mxu1 %v3644_v39  ;;  %v3637_v39 = vld [vmem:[%s4872_s17 + $0x8c] ss:$16 sps:$4 sm:$0xff]  }
 0x1cf   : > { %1757 = vmatprep.subr.bf16.mxu1 %v3652_v40 }
 0x1d2   : > { %1758 = vmatpush1.bf16.msra.mxu1 %v3650_v41 }
 0x1d3   : > { %1759 = vmatprep.subr.bf16.mxu1 %v3658_v42 }
 0x1d6   : > { %1760 = vmatpush1.bf16.msra.mxu1 %v3656_v43  ;;  %v3635_v43 = vld [vmem:[%s4872_s17 + $0x88] ss:$16 sps:$4 sm:$0xff]  }
 0x1d7   : > { %1761 = vmatprep.subr.bf16.mxu1 %v3664_v44 }
 0x1da   : > { %1762 = vmatpush1.bf16.msra.mxu1 %v3662_v45 }
 0x1db   : > { %1763 = vmatprep.subr.bf16.mxu1 %v3670_v46  ;;  %v3643_v46 = vld [vmem:[%s4872_s17 + $0xac] ss:$16 sps:$4 sm:$0xff]  }
 0x1de   : > { %1764 = vmatpush1.bf16.msra.mxu1 %v3668_v47 }
 0x1df   : > { %1765 = vmatprep.subr.bf16.mxu1 %v3676_v48 }
 0x1e2   : > { %1766 = vmatpush1.bf16.msra.mxu1 %v3674_v49 }
 0x1e3   : > { %1767 = vmatprep.subr.bf16.mxu1 %v3682_v50 }
 0x1e6   : > { %1768 = vmatpush1.bf16.msra.mxu1 %v3680_v51 }
 0x1e7   : > { %1769 = vmatprep.subr.bf16.mxu1 %v3688_v52 }
 0x1ea   : > { %1770 = vmatpush1.bf16.msra.mxu1 %v3686_v53 }
 0x277   : > { %v3405_v55 = vpop.f32.mrb[0].mxu1 }
 0x278   : > { %v990_v56 = vadd.f32 %v3405_v55, %v4395_v54  ;;  %v981_v57 = vpop.f32.mrb[1].mxu1  ;;  %v3641_v55 = vld [vmem:[%s4872_s17 + $0xa8] ss:$16 sps:$4 sm:$0xff]  }
 0x279   : > { %v982_v58 = vadd.f32 %v4395_v54, %v981_v57  ;;  %v3406_v59 = vpop.f32.mrb[2].mxu1 }
 0x27a   : > { %v993_v60 = vadd.f32 %v3406_v59, %v4395_v54  ;;  %v984_v61 = vpop.f32.mrb[3].mxu1  ;;  %v1046_v63 = vmax.f32 %v990_v56, 0.0 }
 0x27b   : > { %v985_v62 = vadd.f32 %v4395_v54, %v984_v61  ;;  %v1044_v1 = vmax.f32 %v982_v58, 0.0  ;;  %v3649_v58 = vld [vmem:[%s4872_s17 + $0xcc] ss:$16 sps:$4 sm:$0xff]  }
 0x27c   : > { %v1047_v0 = vmax.f32 %v993_v60, 0.0 }
 0x27d   : > { %v1045_v2 = vmax.f32 %v985_v62, 0.0  ;;  %v3647_v62 = vld [vmem:[%s4872_s17 + $0xc8] ss:$16 sps:$4 sm:$0xff]  }
 0x27e   : > { %v1061_v3 = vpack.c.bf16 %v1047_v0, %v1046_v63  ;;  %v3655_v0 = vld [vmem:[%s4872_s17 + $0xec] ss:$16 sps:$4 sm:$0xff]  }
 0x27f   : > { %v1060_v6 = vpack.c.bf16 %v1045_v2, %v1044_v1  ;;  %v3409_v7 = vpop.f32.mrb[4].mxu1  ;;  %v3661_v1 = vld [vmem:[%s4872_s17 + $0x10c] ss:$16 sps:$4 sm:$0xff]   ;;  %v3659_v2 = vld [vmem:[%s4872_s17 + $0x108] ss:$16 sps:$4 sm:$0xff]  }
 0x280   : > { %v1006_v10 = vadd.f32 %v3409_v7, %v4395_v54  ;;  %v997_v11 = vpop.f32.mrb[5].mxu1  ;;  %v3671_v7 = vld [vmem:[%s4872_s17 + $0x148] ss:$16 sps:$4 sm:$0xff]  }
 0x281   : > { %v998_v12 = vadd.f32 %v4395_v54, %v997_v11  ;;  %1209 = vmatmul.mubr.bf16.vlgmr.msra.gmra.mrb[16].mxu0 %v1060_v6  ;;  %v3410_v13 = vpop.f32.mrb[6].mxu1  ;;  %v3673_v6 = vld [vmem:[%s4872_s17 + $0x14c] ss:$16 sps:$4 sm:$0xff]  }
 0x282   : > { %v1050_v14 = vmax.f32 %v1006_v10, 0.0  ;;  %v1009_v15 = vadd.f32 %v3410_v13, %v4395_v54  ;;  %v1000_v16 = vpop.f32.mrb[7].mxu1  ;;  %1218 = vmatprep.mubr.bf16.mxu0 %v3925_v24  ;;  %1857 = vmatpush1.bf16.msra.mxu0 %v3611_v5  ;;  %v3665_v5 = vld [vmem:[%s4872_s17 + $0x128] ss:$16 sps:$4 sm:$0xff]   ;;  %v3685_v11 = vld [vmem:[%s4872_s17 + $0x18c] ss:$16 sps:$4 sm:$0xff]  }
 0x283   : > { %v1048_v18 = vmax.f32 %v998_v12, 0.0  ;;  %v1001_v19 = vadd.f32 %v4395_v54, %v1000_v16  ;;  %1858 = vmatprep.subr.bf16.mxu0 %v3619_v8  ;;  %v3679_v8 = vld [vmem:[%s4872_s17 + $0x16c] ss:$16 sps:$4 sm:$0xff]   ;;  %v3677_v10 = vld [vmem:[%s4872_s17 + $0x168] ss:$16 sps:$4 sm:$0xff]  }
 0x284   : > { %v1051_v21 = vmax.f32 %v1009_v15, 0.0  ;;  %v3683_v12 = vld [vmem:[%s4872_s17 + $0x188] ss:$16 sps:$4 sm:$0xff]   ;;  %v3691_v13 = vld [vmem:[%s4872_s17 + $0x1ac] ss:$16 sps:$4 sm:$0xff]  }
 0x285   : > { %v1049_v22 = vmax.f32 %v1001_v19, 0.0  ;;  %v3694_v15 = vld [vmem:[%s4872_s17 + $0x1c4] ss:$16 sps:$4 sm:$0xff]   ;;  %v3697_v16 = vld [vmem:[%s4872_s17 + $0x1cc] ss:$16 sps:$4 sm:$0xff]  }
 0x286   : > { %v1063_v23 = vpack.c.bf16 %v1051_v21, %v1050_v14  ;;  %1859 = vmatpush1.bf16.msra.mxu0 %v3617_v17  ;;  %v3689_v14 = vld [vmem:[%s4872_s17 + $0x1a8] ss:$16 sps:$4 sm:$0xff]   ;;  %1771 = vmatprep.subr.bf16.mxu1 %v3694_v15  ;;  %v3703_v19 = vld [vmem:[%s4872_s17 + $0x1ec] ss:$16 sps:$4 sm:$0xff]  }
 0x287   : > { %v1062_v26 = vpack.c.bf16 %v1049_v22, %v1048_v18  ;;  %v3413_v27 = vpop.f32.mrb[8].mxu1  ;;  %1860 = vmatprep.subr.bf16.mxu0 %v3625_v20  ;;  %v3695_v17 = vld [vmem:[%s4872_s17 + $0x1c8] ss:$16 sps:$4 sm:$0xff]   ;;  %v3700_v18 = vld [vmem:[%s4872_s17 + $0x1e4] ss:$16 sps:$4 sm:$0xff]  }
 0x288   : > { %v1022_v29 = vadd.f32 %v3413_v27, %v4395_v54  ;;  %v1013_v30 = vpop.f32.mrb[9].mxu1  ;;  %v3698_v20 = vld [vmem:[%s4872_s17 + $0x1e0] ss:$16 sps:$4 sm:$0xff]   ;;  %v3701_v21 = vld [vmem:[%s4872_s17 + $0x1e8] ss:$16 sps:$4 sm:$0xff]  }
 0x289   : > { %1219 = vmatmul.mubr.bf16.gmra.mrb[20].mxu0 %v1061_v3  ;;  %v1014_v31 = vadd.f32 %v4395_v54, %v1013_v30  ;;  %v3414_v32 = vpop.f32.mrb[10].mxu1  ;;  %v3667_v3 = vld [vmem:[%s4872_s17 + $0x12c] ss:$16 sps:$4 sm:$0xff]  }
 0x28a   : > { %v1054_v33 = vmax.f32 %v1022_v29, 0.0  ;;  %1228 = vmatprep.mubr.bf16.mxu0 %v3925_v24  ;;  %v1025_v34 = vadd.f32 %v3414_v32, %v4395_v54  ;;  %v1016_v35 = vpop.f32.mrb[11].mxu1  ;;  %1861 = vmatpush1.bf16.msra.mxu0 %v3623_v25  ;;  %v3704_v22 = vld [vmem:[#allocation7 + $0x40] sm:$0xff]   ;;  %v1086_v25 = vlaneseq }
 0x28b   : > { %v1052_v37 = vmax.f32 %v1014_v31, 0.0  ;;  %v1017_v38 = vadd.f32 %v4395_v54, %v1016_v35  ;;  %1862 = vmatprep.subr.bf16.mxu0 %v3631_v28  ;;  %v1084_v28 = vld [vmem:[%s4874_s23] sm:$0x3] }
 0x28c   : > { %v1055_v40 = vmax.f32 %v1025_v34, 0.0 }
 0x28d   : > { %v1053_v41 = vmax.f32 %v1017_v38, 0.0 }
 0x28e   : > { %v1065_v42 = vpack.c.bf16 %v1055_v40, %v1054_v33  ;;  %1863 = vmatpush1.bf16.msra.mxu0 %v3629_v36 }
 0x28f   : > { %v1064_v44 = vpack.c.bf16 %v1053_v41, %v1052_v37  ;;  %v3417_v45 = vpop.f32.mrb[12].mxu1  ;;  %1864 = vmatprep.subr.bf16.mxu0 %v3637_v39 }
 0x290   : > { %v1038_v47 = vadd.f32 %v3417_v45, %v4395_v54  ;;  %v1029_v48 = vpop.f32.mrb[13].mxu1 }
 0x291   : > { %1229 = vmatmul.mubr.bf16.gmra.mrb[24].mxu0 %v1062_v26  ;;  %v1030_v49 = vadd.f32 %v4395_v54, %v1029_v48  ;;  %v3418_v50 = vpop.f32.mrb[14].mxu1  ;;  %v4528_v26 = vshrl.u32 %v1086_v25, 7  ;;  %v4547_v48 = vld [vmem:[#allocation9] sm:$0xff]  }
 0x292   : > { %1238 = vmatprep.mubr.bf16.mxu0 %v3925_v24  ;;  %v1058_v51 = vmax.f32 %v1038_v47, 0.0  ;;  %v1041_v52 = vadd.f32 %v3418_v50, %v4395_v54  ;;  %v1032_v53 = vpop.f32.mrb[15].mxu1  ;;  %1865 = vmatpush1.bf16.msra.mxu0 %v3635_v43  ;;  %v3705_v47 = vld [vmem:[#allocation7] sm:$0xff]  }
 0x293   : > { %v1056_v56 = vmax.f32 %v1030_v49, 0.0  ;;  %v1033_v57 = vadd.f32 %v4395_v54, %v1032_v53  ;;  %1866 = vmatprep.subr.bf16.mxu0 %v3643_v46  ;;  %v3653_v54 = vld [vmem:[%s4872_s17 + $0xe8] ss:$16 sps:$4 sm:$0xff]   ;;  %v1088_v27 = vsub.s32 0, %v4528_v26  ;;  %v1092_v29 = vsub.s32 1, %v4528_v26 }
 0x294   : > { %v1059_v59 = vmax.f32 %v1041_v52, 0.0  ;;  %v4550_v52 = vld [vmem:[#allocation9 + $0x48] sm:$0xff]  }
 0x295   : > { %v1057_v60 = vmax.f32 %v1033_v57, 0.0  ;;  %v4537_v30 = vrot.slane %v1084_v28, %v1088_v27  ;;  %v4541_v31 = vrot.slane %v1084_v28, %v1092_v29 }
 0x296   : > { %v1067_v61 = vpack.c.bf16 %v1059_v59, %v1058_v51  ;;  %1867 = vmatpush1.bf16.msra.mxu0 %v3641_v55  ;;  %v3706_v51 = vld [vmem:[#allocation7 + $0x48] sm:$0xff]  }
 0x297   : > { %v1066_v63 = vpack.c.bf16 %v1057_v60, %v1056_v56  ;;  %1868 = vmatprep.subr.bf16.mxu0 %v3649_v58  ;;  %v3707_v59 = vld [vmem:[#allocation7 + $0x8] sm:$0xff]  }
 0x298   : > { %v4556_v60 = vld [vmem:[#allocation9 + $0x8] sm:$0xff]  }
 0x299   : > { %1239 = vmatmul.mubr.bf16.gmra.mrb[28].mxu0 %v1063_v23  ;;  %v4525_v23 = vld [vmem:[#allocation9 + $0x40] sm:$0xff]  }
 0x29a   : > { %1248 = vmatprep.mubr.bf16.mxu0 %v3925_v24  ;;  %1869 = vmatpush1.bf16.msra.mxu0 %v3647_v62 }
 0x29b   : > { %1870 = vmatprep.subr.bf16.mxu0 %v3655_v0  ;;  %v4559_v0 = vld [vmem:[#allocation9 + $0x50] sm:$0xff]  }
 0x29e   : > { %1871 = vmatpush1.bf16.msra.mxu0 %v3653_v54 }
 0x29f   : > { %1872 = vmatprep.subr.bf16.mxu0 %v3661_v1 }
 0x2a1   : > { %1249 = vmatmul.mubr.bf16.gmra.mrb[32].mxu0 %v1064_v44 }
 0x2a2   : > { %1258 = vmatprep.mubr.bf16.mxu0 %v3925_v24  ;;  %1873 = vmatpush1.bf16.msra.mxu0 %v3659_v2 }
 0x2a3   : > { %1874 = vmatprep.subr.bf16.mxu0 %v3667_v3 }
 0x2a6   : > { %1875 = vmatpush1.bf16.msra.mxu0 %v3665_v5 }
 0x2a7   : > { %1876 = vmatprep.subr.bf16.mxu0 %v3673_v6  ;;  %v3711_v6 = vld [vmem:[#allocation7 + $0x10] sm:$0xff]  }
 0x2a9   : > { %1259 = vmatmul.mubr.bf16.gmra.mrb[36].mxu0 %v1065_v42 }
 0x2aa   : > { %1268 = vmatprep.mubr.bf16.mxu0 %v3925_v24  ;;  %1877 = vmatpush1.bf16.msra.mxu0 %v3671_v7  ;;  %v4562_v7 = vld [vmem:[#allocation9 + $0x10] sm:$0xff]  }
 0x2ab   : > { %1878 = vmatprep.subr.bf16.mxu0 %v3679_v8 }
 0x2ae   : > { %1879 = vmatpush1.bf16.msra.mxu0 %v3677_v10 }
 0x2af   : > { %1880 = vmatprep.subr.bf16.mxu0 %v3685_v11  ;;  %v3714_v11 = vld [vmem:[#allocation7 + $0x58] sm:$0xff]  }
 0x2b1   : > { %1269 = vmatmul.mubr.bf16.gmra.mrb[40].mxu0 %v1066_v63  ;;  %v3710_v63 = vld [vmem:[#allocation7 + $0x50] sm:$0xff]  }
 0x2b2   : > { %1278 = vmatprep.mubr.bf16.mxu0 %v3925_v24  ;;  %1881 = vmatpush1.bf16.msra.mxu0 %v3683_v12  ;;  %v3692_v24 = vld [vmem:[%s4872_s17 + $0x1c0] ss:$16 sps:$4 sm:$0xff]  }
 0x2b3   : > { %1882 = vmatprep.subr.bf16.mxu0 %v3691_v13  ;;  %1772 = vmatpush1.bf16.msra.mxu1 %v3692_v24  ;;  %v4566_v12 = vld [vmem:[#allocation9 + $0x58] sm:$0xff]  }
 0x2b4   : > { %1773 = vmatprep.subr.bf16.mxu1 %v3700_v18  ;;  %v4572_v18 = vld [vmem:[#allocation9 + $0x18] sm:$0xff]  }
 0x2b6   : > { %1883 = vmatpush1.bf16.msra.mxu0 %v3689_v14 }
 0x2b7   : > { %1884 = vmatprep.subr.bf16.mxu0 %v3697_v16  ;;  %1774 = vmatpush1.bf16.msra.mxu1 %v3698_v20 }
 0x2b8   : > { %3212 = vmatprep.subr.bf16.mxu1 %v3704_v22  ;;  %v4575_v22 = vld [vmem:[#allocation9 + $0x60] sm:$0xff]  }
 0x2b9   : > { %1279 = vmatmul.mubr.bf16.gmra.mrb[44].mxu0 %v1067_v61 }
 0x2ba   : > { %1885 = vmatpush1.bf16.msra.mxu0 %v3695_v17  ;;  %v3715_v17 = vld [vmem:[#allocation7 + $0x18] sm:$0xff]  }
 0x2bb   : > { %1886 = vmatprep.subr.bf16.mxu0 %v3703_v19 }
 0x2be   : > { %1887 = vmatpush1.bf16.msra.mxu0 %v3701_v21  ;;  %v3718_v21 = vld [vmem:[#allocation7 + $0x60] sm:$0xff]  }
 0x2bf   : > { %3276 = vmatprep.subr.bf16.mxu0 %v4525_v23 }
 0x354   : > { %v1210_v32 = vpop.f32.mrb[16].mxu0 }
 0x355   : > { %v1211_v33 = vadd.f32 %v1210_v32, %v4537_v30  ;;  %v1212_v34 = vpop.f32.mrb[17].mxu0 }
 0x356   : > { %v1213_v35 = vadd.f32 %v1212_v34, %v4541_v31  ;;  %v1214_v36 = vpop.f32.mrb[18].mxu0 }
 0x357   : > { %v1215_v37 = vadd.f32 %v1214_v36, %v4537_v30  ;;  %v1216_v38 = vpop.f32.mrb[19].mxu0  ;;  %v1289_v40 = vmax.f32 %v1211_v33, 0.0  ;;  %v4578_v36 = vld [vmem:[#allocation9 + $0x20] sm:$0xff]  }
 0x358   : > { %v1217_v39 = vadd.f32 %v1216_v38, %v4541_v31  ;;  %v1290_v42 = vmax.f32 %v1213_v35, 0.0  ;;  %v3719_v35 = vld [vmem:[#allocation7 + $0x20] sm:$0xff]  }
 0x359   : > { %v1291_v41 = vmax.f32 %v1215_v37, 0.0 }
 0x35a   : > { %v1292_v43 = vmax.f32 %v1217_v39, 0.0  ;;  %v3722_v39 = vld [vmem:[#allocation7 + $0x68] sm:$0xff]  }
 0x35b   : > { %v1321_v44 = vpack.c.bf16 %v1291_v41, %v1289_v40  ;;  %v4582_v40 = vld [vmem:[#allocation9 + $0x68] sm:$0xff]  }
 0x35c   : > { %v1322_v45 = vpack.c.bf16 %v1292_v43, %v1290_v42  ;;  %v1220_v46 = vpop.f32.mrb[20].mxu0 }
 0x35d   : > { %v1221_v49 = vadd.f32 %v1220_v46, %v4537_v30  ;;  %v1222_v50 = vpop.f32.mrb[21].mxu0  ;;  %v3723_v46 = vld [vmem:[#allocation7 + $0x28] sm:$0xff]  }
 0x35e   : > { %v1223_v53 = vadd.f32 %v1222_v50, %v4541_v31  ;;  %v1224_v55 = vpop.f32.mrb[22].mxu0  ;;  %1775 = vmatprep.mubr.bf16.mxu1 %v1322_v45  ;;  %1888 = vmatprep.mubr.bf16.mxu0 %v1322_v45 }
 0x35f   : > { %v1225_v56 = vadd.f32 %v1224_v55, %v4537_v30  ;;  %v1226_v57 = vpop.f32.mrb[23].mxu0  ;;  %1776 = vmatmul.mubr.bf16.vlgmr.msra.gmra.mrb[16].mxu1 %v1321_v44  ;;  %1889 = vmatmul.mubr.bf16.vlgmr.msra.gmra.mrb[48].mxu0 %v1321_v44  ;;  %v1293_v61 = vmax.f32 %v1221_v49, 0.0 }
 0x360   : > { %v1227_v58 = vadd.f32 %v1226_v57, %v4541_v31  ;;  %3213 = vmatpush3.bf16.msra.mxu1 %v3705_v47  ;;  %3277 = vmatpush3.bf16.msra.mxu0 %v4547_v48  ;;  %v1294_v54 = vmax.f32 %v1223_v53, 0.0  ;;  %v4588_v47 = vld [vmem:[#allocation9 + $0x28] sm:$0xff]  }
 0x361   : > { %v1295_v62 = vmax.f32 %v1225_v56, 0.0  ;;  %3214 = vmatprep.subr.bf16.mxu1 %v3706_v51  ;;  %3278 = vmatprep.subr.bf16.mxu0 %v4550_v52  ;;  %v3726_v51 = vld [vmem:[#allocation7 + $0x70] sm:$0xff]  }
 0x362   : > { %v1296_v1 = vmax.f32 %v1227_v58, 0.0 }
 0x363   : > { %v1323_v2 = vpack.c.bf16 %v1295_v62, %v1293_v61 }
 0x364   : > { %v1324_v3 = vpack.c.bf16 %v1296_v1, %v1294_v54  ;;  %v1230_v5 = vpop.f32.mrb[24].mxu0  ;;  %3215 = vmatpush3.bf16.msra.mxu1 %v3707_v59  ;;  %3279 = vmatpush3.bf16.msra.mxu0 %v4556_v60  ;;  %v3727_v59 = vld [vmem:[#allocation7 + $0x30] sm:$0xff]  }
 0x365   : > { %v1231_v8 = vadd.f32 %v1230_v5, %v4537_v30  ;;  %v1232_v10 = vpop.f32.mrb[25].mxu0  ;;  %3216 = vmatprep.subr.bf16.mxu1 %v3710_v63  ;;  %3280 = vmatprep.subr.bf16.mxu0 %v4559_v0 }
 0x366   : > { %v1233_v13 = vadd.f32 %v1232_v10, %v4541_v31  ;;  %v1234_v14 = vpop.f32.mrb[26].mxu0  ;;  %1785 = vmatprep.mubr.bf16.mxu1 %v1324_v3  ;;  %1898 = vmatprep.mubr.bf16.mxu0 %v1324_v3 }
 0x367   : > { %v1235_v15 = vadd.f32 %v1234_v14, %v4537_v30  ;;  %v1236_v16 = vpop.f32.mrb[27].mxu0  ;;  %1786 = vmatmul.mubr.bf16.gmra.mrb[20].mxu1 %v1323_v2  ;;  %1899 = vmatmul.mubr.bf16.gmra.mrb[52].mxu0 %v1323_v2  ;;  %v1297_v19 = vmax.f32 %v1231_v8, 0.0 }
 0x368   : > { %v1237_v24 = vadd.f32 %v1236_v16, %v4541_v31  ;;  %3217 = vmatpush3.bf16.msra.mxu1 %v3711_v6  ;;  %3281 = vmatpush3.bf16.msra.mxu0 %v4562_v7  ;;  %v1298_v25 = vmax.f32 %v1233_v13, 0.0 }
 0x369   : > { %v1299_v20 = vmax.f32 %v1235_v15, 0.0  ;;  %3218 = vmatprep.subr.bf16.mxu1 %v3714_v11  ;;  %3282 = vmatprep.subr.bf16.mxu0 %v4566_v12 }
 0x36a   : > { %v1300_v28 = vmax.f32 %v1237_v24, 0.0 }
 0x36b   : > { %v1325_v32 = vpack.c.bf16 %v1299_v20, %v1297_v19 }
 0x36c   : > { %v1326_v33 = vpack.c.bf16 %v1300_v28, %v1298_v25  ;;  %v1240_v34 = vpop.f32.mrb[28].mxu0  ;;  %3219 = vmatpush3.bf16.msra.mxu1 %v3715_v17  ;;  %3283 = vmatpush3.bf16.msra.mxu0 %v4572_v18 }
 0x36d   : > { %v1241_v37 = vadd.f32 %v1240_v34, %v4537_v30  ;;  %v1242_v38 = vpop.f32.mrb[29].mxu0  ;;  %3220 = vmatprep.subr.bf16.mxu1 %v3718_v21  ;;  %3284 = vmatprep.subr.bf16.mxu0 %v4575_v22 }
 0x36e   : > { %v1243_v41 = vadd.f32 %v1242_v38, %v4541_v31  ;;  %v1244_v42 = vpop.f32.mrb[30].mxu0  ;;  %1795 = vmatprep.mubr.bf16.mxu1 %v1326_v33  ;;  %1908 = vmatprep.mubr.bf16.mxu0 %v1326_v33 }
 0x36f   : > { %v1245_v43 = vadd.f32 %v1244_v42, %v4537_v30  ;;  %v1246_v44 = vpop.f32.mrb[31].mxu0  ;;  %1796 = vmatmul.mubr.bf16.gmra.mrb[24].mxu1 %v1325_v32  ;;  %1909 = vmatmul.mubr.bf16.gmra.mrb[56].mxu0 %v1325_v32  ;;  %v1301_v49 = vmax.f32 %v1241_v37, 0.0 }
 0x370   : > { %v1247_v45 = vadd.f32 %v1246_v44, %v4541_v31  ;;  %3221 = vmatpush3.bf16.msra.mxu1 %v3719_v35  ;;  %3285 = vmatpush3.bf16.msra.mxu0 %v4578_v36  ;;  %v1302_v53 = vmax.f32 %v1243_v41, 0.0 }
 0x371   : > { %v1303_v50 = vmax.f32 %v1245_v43, 0.0  ;;  %3222 = vmatprep.subr.bf16.mxu1 %v3722_v39  ;;  %3286 = vmatprep.subr.bf16.mxu0 %v4582_v40 }
 0x372   : > { %v1304_v55 = vmax.f32 %v1247_v45, 0.0 }
 0x373   : > { %v1327_v56 = vpack.c.bf16 %v1303_v50, %v1301_v49 }
 0x374   : > { %v1328_v57 = vpack.c.bf16 %v1304_v55, %v1302_v53  ;;  %v1250_v58 = vpop.f32.mrb[32].mxu0  ;;  %3223 = vmatpush3.bf16.msra.mxu1 %v3723_v46  ;;  %3287 = vmatpush3.bf16.msra.mxu0 %v4588_v47 }
 0x375   : > { %v1251_v61 = vadd.f32 %v1250_v58, %v4537_v30  ;;  %v1252_v62 = vpop.f32.mrb[33].mxu0  ;;  %3224 = vmatprep.subr.bf16.mxu1 %v3726_v51 }
 0x376   : > { %v1253_v63 = vadd.f32 %v1252_v62, %v4541_v31  ;;  %v1254_v54 = vpop.f32.mrb[34].mxu0  ;;  %1805 = vmatprep.mubr.bf16.mxu1 %v1328_v57  ;;  %1918 = vmatprep.mubr.bf16.mxu0 %v1328_v57 }
 0x377   : > { %v1255_v1 = vadd.f32 %v1254_v54, %v4537_v30  ;;  %v1256_v2 = vpop.f32.mrb[35].mxu0  ;;  %1806 = vmatmul.mubr.bf16.gmra.mrb[28].mxu1 %v1327_v56  ;;  %1919 = vmatmul.mubr.bf16.gmra.mrb[60].mxu0 %v1327_v56  ;;  %v1305_v5 = vmax.f32 %v1251_v61, 0.0 }
 0x378   : > { %v1257_v3 = vadd.f32 %v1256_v2, %v4541_v31  ;;  %3225 = vmatpush3.bf16.msra.mxu1 %v3727_v59  ;;  %v1306_v8 = vmax.f32 %v1253_v63, 0.0 }
 0x379   : > { %v1307_v6 = vmax.f32 %v1255_v1, 0.0 }
 0x37a   : > { %v1308_v10 = vmax.f32 %v1257_v3, 0.0 }
 0x37b   : > { %v1329_v11 = vpack.c.bf16 %v1307_v6, %v1305_v5 }
 0x37c   : > { %v1330_v13 = vpack.c.bf16 %v1308_v10, %v1306_v8  ;;  %v1260_v14 = vpop.f32.mrb[36].mxu0  ;;  %v4608_v10 = vld [vmem:[#allocation9 + $0x70] sm:$0xff]  }
 0x37d   : > { %v1261_v15 = vadd.f32 %v1260_v14, %v4537_v30  ;;  %v1262_v16 = vpop.f32.mrb[37].mxu0  ;;  %3288 = vmatprep.subr.bf16.mxu0 %v4608_v10  ;;  %v4616_v14 = vld [vmem:[#allocation9 + $0x38] sm:$0xff]  }
 0x37e   : > { %v1263_v24 = vadd.f32 %v1262_v16, %v4541_v31  ;;  %v1264_v17 = vpop.f32.mrb[38].mxu0  ;;  %1815 = vmatprep.mubr.bf16.mxu1 %v1330_v13  ;;  %1928 = vmatprep.mubr.bf16.mxu0 %v1330_v13  ;;  %v3731_v13 = vld [vmem:[#allocation7 + $0x38] sm:$0xff]   ;;  %v2670_v16 = vrot.slane %v4282_v9, 4 }
 0x37f   : > { %v1265_v19 = vadd.f32 %v1264_v17, %v4537_v30  ;;  %v1266_v20 = vpop.f32.mrb[39].mxu0  ;;  %1816 = vmatmul.mubr.bf16.gmra.mrb[32].mxu1 %v1329_v11  ;;  %1929 = vmatmul.mubr.bf16.gmra.mrb[64].mxu0 %v1329_v11  ;;  %v1309_v25 = vmax.f32 %v1261_v15, 0.0  ;;  %v4610_v11 = vld [vmem:[#allocation9 + $0x30] sm:$0xff]   ;;  %v2649_v15 = vrot.slane %v4279_v4, 4 }
 0x380   : > { %v1267_v21 = vadd.f32 %v1266_v20, %v4541_v31  ;;  %v1310_v32 = vmax.f32 %v1263_v24, 0.0  ;;  %3289 = vmatpush3.bf16.msra.mxu0 %v4610_v11  ;;  %v2671_v17 = vadd.f32 %v2670_v16, %v4282_v9  ;;  %v1417_v9 = vsub.s32 3, %v4528_v26 }
 0x381   : > { %v1311_v28 = vmax.f32 %v1265_v19, 0.0  ;;  %v2650_v24 = vadd.f32 %v2649_v15, %v4279_v4  ;;  %v1401_v4 = vld [vmem:[%s4875_s8] sm:$0xf] }
 0x382   : > { %v1312_v33 = vmax.f32 %v1267_v21, 0.0  ;;  %v2672_v20 = vrot.slane %v2671_v17, 2 }
 0x383   : > { %v1331_v34 = vpack.c.bf16 %v1311_v28, %v1309_v25  ;;  %v2651_v19 = vrot.slane %v2650_v24, 2 }
 0x384   : > { %v1332_v35 = vpack.c.bf16 %v1312_v33, %v1310_v32  ;;  %v1270_v37 = vpop.f32.mrb[40].mxu0  ;;  %v2673_v25 = vadd.f32 %v2672_v20, %v2671_v17 }
 0x385   : > { %v1271_v38 = vadd.f32 %v1270_v37, %v4537_v30  ;;  %v1272_v39 = vpop.f32.mrb[41].mxu0  ;;  %v2652_v21 = vadd.f32 %v2651_v19, %v2650_v24  ;;  %v4635_v37 = vrot.slane %v1401_v4, %v1088_v27 }
 0x386   : > { %v1273_v41 = vadd.f32 %v1272_v39, %v4541_v31  ;;  %v1274_v42 = vpop.f32.mrb[42].mxu0  ;;  %1825 = vmatprep.mubr.bf16.mxu1 %v1332_v35  ;;  %1938 = vmatprep.mubr.bf16.mxu0 %v1332_v35  ;;  %v2674_v32 = vrot.slane %v2673_v25, 1  ;;  %v4641_v39 = vrot.slane %v1401_v4, %v1092_v29 }
 0x387   : > { %v1275_v43 = vadd.f32 %v1274_v42, %v4537_v30  ;;  %v1276_v44 = vpop.f32.mrb[43].mxu0  ;;  %1826 = vmatmul.mubr.bf16.gmra.mrb[36].mxu1 %v1331_v34  ;;  %1939 = vmatmul.mubr.bf16.gmra.mrb[68].mxu0 %v1331_v34  ;;  %v1313_v46 = vmax.f32 %v1271_v38, 0.0  ;;  %v2653_v28 = vrot.slane %v2652_v21, 1 }
 0x388   : > { %v1277_v45 = vadd.f32 %v1276_v44, %v4541_v31  ;;  %v1314_v50 = vmax.f32 %v1273_v41, 0.0  ;;  %v2675_v34 = vadd.f32 %v2674_v32, %v2673_v25  ;;  %v4643_v41 = vrot.slane %v1401_v4, %v1417_v9 }
 0x389   : > { %v1315_v49 = vmax.f32 %v1275_v43, 0.0  ;;  %v2654_v33 = vadd.f32 %v2653_v28, %v2652_v21 }
 0x38a   : > { %v1316_v51 = vmax.f32 %v1277_v45, 0.0 }
 0x38b   : > { %v1333_v53 = vpack.c.bf16 %v1315_v49, %v1313_v46  ;;  %v4626_v35 = vsel %vm2616_vm4, %v2675_v34, %v2654_v33 }
 0x38c   : > { %v1334_v55 = vpack.c.bf16 %v1316_v51, %v1314_v50  ;;  %v1280_v56 = vpop.f32.mrb[44].mxu0 }
 0x38d   : > { %v1281_v57 = vadd.f32 %v1280_v56, %v4537_v30  ;;  %v1282_v58 = vpop.f32.mrb[45].mxu0 }
 0x38e   : > { %v1283_v59 = vadd.f32 %v1282_v58, %v4541_v31  ;;  %v1284_v61 = vpop.f32.mrb[46].mxu0  ;;  %1835 = vmatprep.mubr.bf16.mxu1 %v1334_v55  ;;  %1948 = vmatprep.mubr.bf16.mxu0 %v1334_v55 }
 0x38f   : > { %v1285_v62 = vadd.f32 %v1284_v61, %v4537_v30  ;;  %v1286_v63 = vpop.f32.mrb[47].mxu0  ;;  %1836 = vmatmul.mubr.bf16.gmra.mrb[40].mxu1 %v1333_v53  ;;  %1949 = vmatmul.mubr.bf16.gmra.mrb[72].mxu0 %v1333_v53  ;;  %v1317_v1 = vmax.f32 %v1281_v57, 0.0  ;;  %v3730_v30 = vld [vmem:[#allocation7 + $0x78] sm:$0xff]  }
 0x390   : > { %v1287_v54 = vadd.f32 %v1286_v63, %v4541_v31  ;;  %v1318_v3 = vmax.f32 %v1283_v59, 0.0  ;;  %v4614_v31 = vld [vmem:[#allocation9 + $0x78] sm:$0xff]   ;;  %3226 = vmatprep.subr.bf16.mxu1 %v3730_v30 }
 0x391   : > { %v1319_v2 = vmax.f32 %v1285_v62, 0.0  ;;  %3290 = vmatprep.subr.bf16.mxu0 %v4614_v31  ;;  %3227 = vmatpush3.bf16.msra.mxu1 %v3731_v13 }
 0x392   : > { %v1320_v5 = vmax.f32 %v1287_v54, 0.0  ;;  %3291 = vmatpush3.bf16.msra.mxu0 %v4616_v14  ;;  %3456 = vmatprep.subr.bf16.mxu1 %v4525_v23  ;;  %v1413_v23 = vsub.s32 2, %v4528_v26 }
 0x393   : > { %v1335_v6 = vpack.c.bf16 %v1319_v2, %v1317_v1 }
 0x394   : > { %v1336_v8 = vpack.c.bf16 %v1320_v5, %v1318_v3  ;;  %v4637_v38 = vrot.slane %v1401_v4, %v1413_v23 }
 0x396   : > { %1845 = vmatprep.mubr.bf16.mxu1 %v1336_v8  ;;  %1958 = vmatprep.mubr.bf16.mxu0 %v1336_v8 }
 0x397   : > { %1846 = vmatmul.mubr.bf16.gmra.mrb[44].mxu1 %v1335_v6  ;;  %1959 = vmatmul.mubr.bf16.gmra.mrb[76].mxu0 %v1335_v6 }
 0x432   : > { %v1777_v42 = vpop.f32.mrb[16].mxu1  ;;  %v1890_v43 = vpop.f32.mrb[48].mxu0 }
 0x433   : > { %v1778_v44 = vadd.f32 %v1777_v42, %v4635_v37  ;;  %v1891_v45 = vadd.f32 %v1890_v43, %v4637_v38  ;;  %v1779_v46 = vpop.f32.mrb[17].mxu1  ;;  %v1892_v49 = vpop.f32.mrb[49].mxu0 }
 0x434   : > { %v1780_v50 = vadd.f32 %v1779_v46, %v4641_v39  ;;  %v1893_v27 = vadd.f32 %v1892_v49, %v4643_v41  ;;  %v1781_v51 = vpop.f32.mrb[18].mxu1  ;;  %v1894_v53 = vpop.f32.mrb[50].mxu0 }
 0x435   : > { %v1782_v55 = vadd.f32 %v1781_v51, %v4635_v37  ;;  %v1895_v29 = vadd.f32 %v1894_v53, %v4637_v38  ;;  %v1783_v56 = vpop.f32.mrb[19].mxu1  ;;  %v1896_v57 = vpop.f32.mrb[51].mxu0  ;;  %v1969_v61 = vmax.f32 %v1778_v44, 0.0  ;;  %v1971_v62 = vmax.f32 %v1891_v45, 0.0 }
 0x436   : > { %v1784_v58 = vadd.f32 %v1783_v56, %v4641_v39  ;;  %v1897_v59 = vadd.f32 %v1896_v57, %v4643_v41  ;;  %v1970_v1 = vmax.f32 %v1780_v50, 0.0  ;;  %v1972_v2 = vmax.f32 %v1893_v27, 0.0 }
 0x437   : > { %v1973_v63 = vmax.f32 %v1782_v55, 0.0  ;;  %v1975_v54 = vmax.f32 %v1895_v29, 0.0 }
 0x438   : > { %v1974_v3 = vmax.f32 %v1784_v58, 0.0  ;;  %v1976_v5 = vmax.f32 %v1897_v59, 0.0 }
 0x439   : > { %v2033_v6 = vpack.c.bf16 %v1973_v63, %v1969_v61  ;;  %v2035_v8 = vpack.c.bf16 %v1975_v54, %v1971_v62 }
 0x43a   : > { %v2034_v30 = vpack.c.bf16 %v1974_v3, %v1970_v1  ;;  %v2036_v13 = vpack.c.bf16 %v1976_v5, %v1972_v2  ;;  %v1787_v15 = vpop.f32.mrb[20].mxu1  ;;  %v1900_v16 = vpop.f32.mrb[52].mxu0 }
 0x43b   : > { %v1788_v24 = vadd.f32 %v1787_v15, %v4635_v37  ;;  %v1901_v17 = vadd.f32 %v1900_v16, %v4637_v38  ;;  %v1789_v19 = vpop.f32.mrb[21].mxu1  ;;  %v1902_v20 = vpop.f32.mrb[53].mxu0 }
 0x43c   : > { %v1790_v21 = vadd.f32 %v1789_v19, %v4641_v39  ;;  %v1903_v25 = vadd.f32 %v1902_v20, %v4643_v41  ;;  %v1791_v28 = vpop.f32.mrb[22].mxu1  ;;  %v1904_v32 = vpop.f32.mrb[54].mxu0  ;;  %2232 = vmatprep.mubr.bf16.mxu1 %v2034_v30  ;;  %2480 = vmatprep.mubr.bf16.mxu0 %v2036_v13 }
 0x43d   : > { %v1792_v33 = vadd.f32 %v1791_v28, %v4635_v37  ;;  %v1905_v34 = vadd.f32 %v1904_v32, %v4637_v38  ;;  %v1793_v23 = vpop.f32.mrb[23].mxu1  ;;  %v1906_v4 = vpop.f32.mrb[55].mxu0  ;;  %2233 = vmatmul.mubr.bf16.vlgmr.msra.gmra.mrb[48].mxu1 %v2033_v6  ;;  %2481 = vmatmul.mubr.bf16.vlgmr.msra.gmra.mrb[80].mxu0 %v2035_v8  ;;  %v1977_v43 = vmax.f32 %v1788_v24, 0.0  ;;  %v1979_v44 = vmax.f32 %v1901_v17, 0.0 }
 0x43e   : > { %v1794_v9 = vadd.f32 %v1793_v23, %v4641_v39  ;;  %v1907_v42 = vadd.f32 %v1906_v4, %v4643_v41  ;;  %3464 = vmatpush3.bf16.msra.mxu1 %v4547_v48  ;;  %v1978_v49 = vmax.f32 %v1790_v21, 0.0  ;;  %v1980_v50 = vmax.f32 %v1903_v25, 0.0 }
 0x43f   : > { %v1981_v45 = vmax.f32 %v1792_v33, 0.0  ;;  %v1983_v46 = vmax.f32 %v1905_v34, 0.0  ;;  %3457 = vmatprep.subr.bf16.mxu1 %v4550_v52 }
 0x440   : > { %v1982_v27 = vmax.f32 %v1794_v9, 0.0  ;;  %v1984_v51 = vmax.f32 %v1907_v42, 0.0 }
 0x441   : > { %v2037_v53 = vpack.c.bf16 %v1981_v45, %v1977_v43  ;;  %v2039_v55 = vpack.c.bf16 %v1983_v46, %v1979_v44 }
 0x442   : > { %v2038_v29 = vpack.c.bf16 %v1982_v27, %v1978_v49  ;;  %v2040_v56 = vpack.c.bf16 %v1984_v51, %v1980_v50  ;;  %v1797_v57 = vpop.f32.mrb[24].mxu1  ;;  %v1910_v58 = vpop.f32.mrb[56].mxu0  ;;  %3465 = vmatpush3.bf16.msra.mxu1 %v4556_v60 }
 0x443   : > { %v1798_v48 = vadd.f32 %v1797_v57, %v4635_v37  ;;  %v1911_v59 = vadd.f32 %v1910_v58, %v4637_v38  ;;  %v1799_v61 = vpop.f32.mrb[25].mxu1  ;;  %v1912_v62 = vpop.f32.mrb[57].mxu0  ;;  %3458 = vmatprep.subr.bf16.mxu1 %v4559_v0 }
 0x444   : > { %v1800_v52 = vadd.f32 %v1799_v61, %v4641_v39  ;;  %v1913_v63 = vadd.f32 %v1912_v62, %v4643_v41  ;;  %v1801_v54 = vpop.f32.mrb[26].mxu1  ;;  %v1914_v1 = vpop.f32.mrb[58].mxu0  ;;  %2240 = vmatprep.mubr.bf16.mxu1 %v2038_v29  ;;  %2488 = vmatprep.mubr.bf16.mxu0 %v2040_v56 }
 0x445   : > { %v1802_v2 = vadd.f32 %v1801_v54, %v4635_v37  ;;  %v1915_v60 = vadd.f32 %v1914_v1, %v4637_v38  ;;  %v1803_v3 = vpop.f32.mrb[27].mxu1  ;;  %v1916_v5 = vpop.f32.mrb[59].mxu0  ;;  %2241 = vmatmul.mubr.bf16.gmra.mrb[52].mxu1 %v2037_v53  ;;  %2489 = vmatmul.mubr.bf16.gmra.mrb[84].mxu0 %v2039_v55  ;;  %v1985_v8 = vmax.f32 %v1798_v48, 0.0  ;;  %v1987_v30 = vmax.f32 %v1911_v59, 0.0 }
 0x446   : > { %v1804_v6 = vadd.f32 %v1803_v3, %v4641_v39  ;;  %v1917_v0 = vadd.f32 %v1916_v5, %v4643_v41  ;;  %3466 = vmatpush3.bf16.msra.mxu1 %v4562_v7  ;;  %v1986_v16 = vmax.f32 %v1800_v52, 0.0  ;;  %v1988_v24 = vmax.f32 %v1913_v63, 0.0 }
 0x447   : > { %v1989_v13 = vmax.f32 %v1802_v2, 0.0  ;;  %v1991_v15 = vmax.f32 %v1915_v60, 0.0  ;;  %3459 = vmatprep.subr.bf16.mxu1 %v4566_v12 }
 0x448   : > { %v1990_v17 = vmax.f32 %v1804_v6, 0.0  ;;  %v1992_v19 = vmax.f32 %v1917_v0, 0.0 }
 0x449   : > { %v2041_v20 = vpack.c.bf16 %v1989_v13, %v1985_v8  ;;  %v2043_v21 = vpack.c.bf16 %v1991_v15, %v1987_v30 }
 0x44a   : > { %v2042_v25 = vpack.c.bf16 %v1990_v17, %v1986_v16  ;;  %v2044_v28 = vpack.c.bf16 %v1992_v19, %v1988_v24  ;;  %v1807_v32 = vpop.f32.mrb[28].mxu1  ;;  %v1920_v33 = vpop.f32.mrb[60].mxu0  ;;  %3467 = vmatpush3.bf16.msra.mxu1 %v4572_v18 }
 0x44b   : > { %v1808_v7 = vadd.f32 %v1807_v32, %v4635_v37  ;;  %v1921_v34 = vadd.f32 %v1920_v33, %v4637_v38  ;;  %v1809_v23 = vpop.f32.mrb[29].mxu1  ;;  %v1922_v4 = vpop.f32.mrb[61].mxu0  ;;  %3460 = vmatprep.subr.bf16.mxu1 %v4575_v22 }
 0x44c   : > { %v1810_v12 = vadd.f32 %v1809_v23, %v4641_v39  ;;  %v1923_v9 = vadd.f32 %v1922_v4, %v4643_v41  ;;  %v1811_v42 = vpop.f32.mrb[30].mxu1  ;;  %v1924_v43 = vpop.f32.mrb[62].mxu0  ;;  %2248 = vmatprep.mubr.bf16.mxu1 %v2042_v25  ;;  %2496 = vmatprep.mubr.bf16.mxu0 %v2044_v28 }
 0x44d   : > { %v1812_v44 = vadd.f32 %v1811_v42, %v4635_v37  ;;  %v1925_v18 = vadd.f32 %v1924_v43, %v4637_v38  ;;  %v1813_v45 = vpop.f32.mrb[31].mxu1  ;;  %v1926_v46 = vpop.f32.mrb[63].mxu0  ;;  %2249 = vmatmul.mubr.bf16.gmra.mrb[56].mxu1 %v2041_v20  ;;  %2497 = vmatmul.mubr.bf16.gmra.mrb[88].mxu0 %v2043_v21  ;;  %v1993_v50 = vmax.f32 %v1808_v7, 0.0  ;;  %v1995_v27 = vmax.f32 %v1921_v34, 0.0 }
 0x44e   : > { %v1814_v49 = vadd.f32 %v1813_v45, %v4641_v39  ;;  %v1927_v22 = vadd.f32 %v1926_v46, %v4643_v41  ;;  %3468 = vmatpush3.bf16.msra.mxu1 %v4578_v36  ;;  %v1994_v55 = vmax.f32 %v1810_v12, 0.0  ;;  %v1996_v29 = vmax.f32 %v1923_v9, 0.0 }
 0x44f   : > { %v1997_v51 = vmax.f32 %v1812_v44, 0.0  ;;  %v1999_v53 = vmax.f32 %v1925_v18, 0.0  ;;  %3461 = vmatprep.subr.bf16.mxu1 %v4582_v40  ;;  %v3926_v12 = vmov 0.0  }
 0x450   : > { %v1998_v56 = vmax.f32 %v1814_v49, 0.0  ;;  %v2000_v57 = vmax.f32 %v1927_v22, 0.0 }
 0x451   : > { %v2045_v58 = vpack.c.bf16 %v1997_v51, %v1993_v50  ;;  %v2047_v48 = vpack.c.bf16 %v1999_v53, %v1995_v27 }
 0x452   : > { %v2046_v59 = vpack.c.bf16 %v1998_v56, %v1994_v55  ;;  %v2048_v61 = vpack.c.bf16 %v2000_v57, %v1996_v29  ;;  %v1817_v62 = vpop.f32.mrb[32].mxu1  ;;  %v1930_v52 = vpop.f32.mrb[64].mxu0  ;;  %3469 = vmatpush3.bf16.msra.mxu1 %v4588_v47 }
 0x453   : > { %v1818_v36 = vadd.f32 %v1817_v62, %v4635_v37  ;;  %v1931_v63 = vadd.f32 %v1930_v52, %v4637_v38  ;;  %v1819_v54 = vpop.f32.mrb[33].mxu1  ;;  %v1932_v1 = vpop.f32.mrb[65].mxu0  ;;  %3462 = vmatprep.subr.bf16.mxu1 %v4608_v10 }
 0x454   : > { %v1820_v40 = vadd.f32 %v1819_v54, %v4641_v39  ;;  %v1933_v2 = vadd.f32 %v1932_v1, %v4643_v41  ;;  %v1821_v60 = vpop.f32.mrb[34].mxu1  ;;  %v1934_v3 = vpop.f32.mrb[66].mxu0  ;;  %2256 = vmatprep.mubr.bf16.mxu1 %v2046_v59  ;;  %2504 = vmatprep.mubr.bf16.mxu0 %v2048_v61 }
 0x455   : > { %v1822_v5 = vadd.f32 %v1821_v60, %v4635_v37  ;;  %v1935_v47 = vadd.f32 %v1934_v3, %v4637_v38  ;;  %v1823_v6 = vpop.f32.mrb[35].mxu1  ;;  %v1936_v0 = vpop.f32.mrb[67].mxu0  ;;  %2257 = vmatmul.mubr.bf16.gmra.mrb[60].mxu1 %v2045_v58  ;;  %2505 = vmatmul.mubr.bf16.gmra.mrb[92].mxu0 %v2047_v48  ;;  %v2001_v30 = vmax.f32 %v1818_v36, 0.0  ;;  %v2003_v13 = vmax.f32 %v1931_v63, 0.0 }
 0x456   : > { %v1824_v8 = vadd.f32 %v1823_v6, %v4641_v39  ;;  %v1937_v10 = vadd.f32 %v1936_v0, %v4643_v41  ;;  %3470 = vmatpush3.bf16.msra.mxu1 %v4610_v11  ;;  %v2002_v24 = vmax.f32 %v1820_v40, 0.0  ;;  %v2004_v17 = vmax.f32 %v1933_v2, 0.0 }
 0x457   : > { %v2005_v15 = vmax.f32 %v1822_v5, 0.0  ;;  %v2007_v16 = vmax.f32 %v1935_v47, 0.0  ;;  %3463 = vmatprep.subr.bf16.mxu1 %v4614_v31 }
 0x458   : > { %v2006_v19 = vmax.f32 %v1824_v8, 0.0  ;;  %v2008_v20 = vmax.f32 %v1937_v10, 0.0 }
 0x459   : > { %v2049_v21 = vpack.c.bf16 %v2005_v15, %v2001_v30  ;;  %v2051_v25 = vpack.c.bf16 %v2007_v16, %v2003_v13 }
 0x45a   : > { %v2050_v28 = vpack.c.bf16 %v2006_v19, %v2002_v24  ;;  %v2052_v32 = vpack.c.bf16 %v2008_v20, %v2004_v17  ;;  %v1827_v33 = vpop.f32.mrb[36].mxu1  ;;  %v1940_v7 = vpop.f32.mrb[68].mxu0  ;;  %3471 = vmatpush3.bf16.msra.mxu1 %v4616_v14 }
 0x45b   : > { %v1828_v11 = vadd.f32 %v1827_v33, %v4635_v37  ;;  %v1941_v34 = vadd.f32 %v1940_v7, %v4637_v38  ;;  %v1829_v23 = vpop.f32.mrb[37].mxu1  ;;  %v1942_v4 = vpop.f32.mrb[69].mxu0  ;;  %3419 = vmatprep.subr.mxu1 %v3926_v12 }
 0x45c   : > { %v1830_v31 = vadd.f32 %v1829_v23, %v4641_v39  ;;  %v1943_v9 = vadd.f32 %v1942_v4, %v4643_v41  ;;  %v1831_v42 = vpop.f32.mrb[38].mxu1  ;;  %v1944_v43 = vpop.f32.mrb[70].mxu0  ;;  %2264 = vmatprep.mubr.bf16.mxu1 %v2050_v28  ;;  %2512 = vmatprep.mubr.bf16.mxu0 %v2052_v32 }
 0x45d   : > { %v1832_v44 = vadd.f32 %v1831_v42, %v4635_v37  ;;  %v1945_v14 = vadd.f32 %v1944_v43, %v4637_v38  ;;  %v1833_v18 = vpop.f32.mrb[39].mxu1  ;;  %v1946_v45 = vpop.f32.mrb[71].mxu0  ;;  %2265 = vmatmul.mubr.bf16.gmra.mrb[64].mxu1 %v2049_v21  ;;  %2513 = vmatmul.mubr.bf16.gmra.mrb[96].mxu0 %v2051_v25  ;;  %v2009_v22 = vmax.f32 %v1828_v11, 0.0  ;;  %v2011_v50 = vmax.f32 %v1941_v34, 0.0 }
 0x45e   : > { %v1834_v46 = vadd.f32 %v1833_v18, %v4641_v39  ;;  %v1947_v49 = vadd.f32 %v1946_v45, %v4643_v41  ;;  %v2010_v53 = vmax.f32 %v1830_v31, 0.0  ;;  %v2012_v55 = vmax.f32 %v1943_v9, 0.0 }
 0x45f   : > { %v2013_v27 = vmax.f32 %v1832_v44, 0.0  ;;  %v2015_v51 = vmax.f32 %v1945_v14, 0.0 }
 0x460   : > { %v2014_v29 = vmax.f32 %v1834_v46, 0.0  ;;  %v2016_v56 = vmax.f32 %v1947_v49, 0.0 }
 0x461   : > { %v2053_v57 = vpack.c.bf16 %v2013_v27, %v2009_v22  ;;  %v2055_v58 = vpack.c.bf16 %v2015_v51, %v2011_v50 }
 0x462   : > { %v2054_v48 = vpack.c.bf16 %v2014_v29, %v2010_v53  ;;  %v2056_v59 = vpack.c.bf16 %v2016_v56, %v2012_v55  ;;  %v1837_v61 = vpop.f32.mrb[40].mxu1  ;;  %v1950_v62 = vpop.f32.mrb[72].mxu0 }
 0x463   : > { %v1838_v52 = vadd.f32 %v1837_v61, %v4635_v37  ;;  %v1951_v36 = vadd.f32 %v1950_v62, %v4637_v38  ;;  %v1839_v63 = vpop.f32.mrb[41].mxu1  ;;  %v1952_v54 = vpop.f32.mrb[73].mxu0  ;;  %v4740_v61 = vld [vmem:[%s4878_s10] ss:$0 sm:$0xff] }
 0x464   : > { %v1840_v1 = vadd.f32 %v1839_v63, %v4641_v39  ;;  %v1953_v40 = vadd.f32 %v1952_v54, %v4643_v41  ;;  %v1841_v2 = vpop.f32.mrb[42].mxu1  ;;  %v1954_v60 = vpop.f32.mrb[74].mxu0  ;;  %2272 = vmatprep.mubr.bf16.mxu1 %v2054_v48  ;;  %2520 = vmatprep.mubr.bf16.mxu0 %v2056_v59  ;;  %v4735_v48 = vld [vmem:[%s4877_s21] ss:$0 sm:$0xff] }
 0x465   : > { %v1842_v3 = vadd.f32 %v1841_v2, %v4635_v37  ;;  %v1955_v5 = vadd.f32 %v1954_v60, %v4637_v38  ;;  %v1843_v47 = vpop.f32.mrb[43].mxu1  ;;  %v1956_v6 = vpop.f32.mrb[75].mxu0  ;;  %2273 = vmatmul.mubr.bf16.gmra.mrb[68].mxu1 %v2053_v57  ;;  %2521 = vmatmul.mubr.bf16.gmra.mrb[100].mxu0 %v2055_v58  ;;  %v2017_v10 = vmax.f32 %v1838_v52, 0.0  ;;  %v2019_v30 = vmax.f32 %v1951_v36, 0.0 }
 0x466   : > { %v1844_v0 = vadd.f32 %v1843_v47, %v4641_v39  ;;  %v1957_v8 = vadd.f32 %v1956_v6, %v4643_v41  ;;  %v2018_v16 = vmax.f32 %v1840_v1, 0.0  ;;  %v2020_v24 = vmax.f32 %v1953_v40, 0.0 }
 0x467   : > { %v2021_v13 = vmax.f32 %v1842_v3, 0.0  ;;  %v2023_v15 = vmax.f32 %v1955_v5, 0.0 }
 0x468   : > { %v2022_v17 = vmax.f32 %v1844_v0, 0.0  ;;  %v2024_v19 = vmax.f32 %v1957_v8, 0.0 }
 0x469   : > { %v2057_v20 = vpack.c.bf16 %v2021_v13, %v2017_v10  ;;  %v2059_v21 = vpack.c.bf16 %v2023_v15, %v2019_v30 }
 0x46a   : > { %v2058_v25 = vpack.c.bf16 %v2022_v17, %v2018_v16  ;;  %v2060_v28 = vpack.c.bf16 %v2024_v19, %v2020_v24  ;;  %v1847_v32 = vpop.f32.mrb[44].mxu1  ;;  %v1960_v33 = vpop.f32.mrb[76].mxu0 }
 0x46b   : > { %v1848_v7 = vadd.f32 %v1847_v32, %v4635_v37  ;;  %v1961_v11 = vadd.f32 %v1960_v33, %v4637_v38  ;;  %v1849_v34 = vpop.f32.mrb[45].mxu1  ;;  %v1962_v23 = vpop.f32.mrb[77].mxu0 }
 0x46c   : > { %v1850_v4 = vadd.f32 %v1849_v34, %v4641_v39  ;;  %v1963_v31 = vadd.f32 %v1962_v23, %v4643_v41  ;;  %v1851_v9 = vpop.f32.mrb[46].mxu1  ;;  %v1964_v42 = vpop.f32.mrb[78].mxu0  ;;  %2280 = vmatprep.mubr.bf16.mxu1 %v2058_v25  ;;  %2528 = vmatprep.mubr.bf16.mxu0 %v2060_v28 }
 0x46d   : > { %v1852_v43 = vadd.f32 %v1851_v9, %v4635_v37  ;;  %v1965_v44 = vadd.f32 %v1964_v42, %v4637_v38  ;;  %v1853_v14 = vpop.f32.mrb[47].mxu1  ;;  %v1966_v18 = vpop.f32.mrb[79].mxu0  ;;  %2281 = vmatmul.mubr.bf16.gmra.mrb[72].mxu1 %v2057_v20  ;;  %2529 = vmatmul.mubr.bf16.gmra.mrb[104].mxu0 %v2059_v21  ;;  %v2025_v49 = vmax.f32 %v1848_v7, 0.0  ;;  %v2027_v22 = vmax.f32 %v1961_v11, 0.0 }
 0x46e   : > { %v1854_v45 = vadd.f32 %v1853_v14, %v4641_v39  ;;  %v1967_v46 = vadd.f32 %v1966_v18, %v4643_v41  ;;  %v2026_v51 = vmax.f32 %v1850_v4, 0.0  ;;  %v2028_v53 = vmax.f32 %v1963_v31, 0.0  ;;  %v2676_v39 = vld [vmem:[%s4876_s18] sm:$0x7] }
 0x46f   : > { %v2029_v50 = vmax.f32 %v1852_v43, 0.0  ;;  %v2031_v27 = vmax.f32 %v1965_v44, 0.0 }
 0x470   : > { %v2030_v55 = vmax.f32 %v1854_v45, 0.0  ;;  %v2032_v29 = vmax.f32 %v1967_v46, 0.0 }
 0x471   : > { %v2061_v56 = vpack.c.bf16 %v2029_v50, %v2025_v49  ;;  %v2063_v37 = vpack.c.bf16 %v2031_v27, %v2027_v22 }
 0x472   : > { %v2062_v57 = vpack.c.bf16 %v2030_v55, %v2026_v51  ;;  %v2064_v38 = vpack.c.bf16 %v2032_v29, %v2028_v53 }
 0x474   : > { %2288 = vmatprep.mubr.bf16.mxu1 %v2062_v57 }
 0x475   : > { %2289 = vmatmul.mubr.bf16.gmra.mrb[76].mxu1 %v2061_v56 }
 0x476   : > { %2536 = vmatprep.mubr.bf16.mxu1 %v2064_v38 }
 0x47d   : > { %2537 = vmatmul.mubr.bf16.vlgmr.msra.gmra.mrb[80].mxu1 %v2063_v37 }
 0x47e   : > { %3420 = vmatpush3.msk.msra.mxu1 %vm758_vm0, %v2676_v39  ;;  %3421 = vmatprep.mubr.msk.f32.mxu1 %vm3927_vm5, %v3926_v12 }
 0x485   : > { %3422 = vmatmul.mubr.msk.f32.vlgmr.msra.gmra.mrb[84].mxu1 %vm2633_vm2, %v4626_v35 }
 0x510   : > { %v3228_v41 = vpop.f32.mrb[48].mxu1  ;;  %v3292_v58 = vpop.f32.mrb[80].mxu0 }
 0x511   : > { %v3229_v59 = vpop.f32.mrb[49].mxu1  ;;  %v3293_v62 = vpop.f32.mrb[81].mxu0 }
 0x512   : > { %v3230_v52 = vadd.f32 %v3229_v59, %v3228_v41  ;;  %v3294_v36 = vadd.f32 %v3293_v62, %v3292_v58  ;;  %v3231_v12 = vpop.f32.mrb[50].mxu1  ;;  %v3295_v63 = vpop.f32.mrb[82].mxu0 }
 0x513   : > { %v3232_v54 = vpop.f32.mrb[51].mxu1  ;;  %v3296_v35 = vpop.f32.mrb[83].mxu0 }
 0x514   : > { %v2235_v1 = vadd.f32 %v3230_v52, %v4735_v48  ;;  %v2483_v40 = vadd.f32 %v3294_v36, %v4740_v61  ;;  %v3233_v2 = vadd.f32 %v3232_v54, %v3231_v12  ;;  %v3297_v60 = vadd.f32 %v3296_v35, %v3295_v63 }
 0x516   : > { %v2238_v3 = vadd.f32 %v3233_v2, %v4735_v48  ;;  %v2486_v5 = vadd.f32 %v3297_v60, %v4740_v61  ;;  %v2297_v47 = vmax.f32 %v2235_v1, 0.0  ;;  %v2545_v6 = vmax.f32 %v2483_v40, 0.0 }
 0x518   : > { %v2298_v0 = vmax.f32 %v2238_v3, 0.0  ;;  %v2546_v8 = vmax.f32 %v2486_v5, 0.0  ;;  %v3234_v10 = vpop.f32.mrb[52].mxu1  ;;  %v3298_v30 = vpop.f32.mrb[84].mxu0 }
 0x519   : > { %v3235_v13 = vpop.f32.mrb[53].mxu1  ;;  %v3299_v15 = vpop.f32.mrb[85].mxu0 }
 0x51a   : > { %v2561_v16 = vadd.f32 %v2298_v0, %v2297_v47  ;;  %v2587_v24 = vadd.f32 %v2546_v8, %v2545_v6  ;;  %v3236_v17 = vadd.f32 %v3235_v13, %v3234_v10  ;;  %v3300_v19 = vadd.f32 %v3299_v15, %v3298_v30  ;;  %v3237_v20 = vpop.f32.mrb[54].mxu1  ;;  %v3301_v21 = vpop.f32.mrb[86].mxu0 }
 0x51b   : > { %v3238_v25 = vpop.f32.mrb[55].mxu1  ;;  %v3302_v28 = vpop.f32.mrb[87].mxu0 }
 0x51c   : > { %v2243_v32 = vadd.f32 %v3236_v17, %v4735_v48  ;;  %v2491_v33 = vadd.f32 %v3300_v19, %v4740_v61  ;;  %v3239_v7 = vadd.f32 %v3238_v25, %v3237_v20  ;;  %v3303_v11 = vadd.f32 %v3302_v28, %v3301_v21 }
 0x51e   : > { %v2299_v34 = vmax.f32 %v2243_v32, 0.0  ;;  %v2547_v23 = vmax.f32 %v2491_v33, 0.0  ;;  %v2246_v4 = vadd.f32 %v3239_v7, %v4735_v48  ;;  %v2494_v31 = vadd.f32 %v3303_v11, %v4740_v61 }
 0x520   : > { %v2562_v9 = vadd.f32 %v2561_v16, %v2299_v34  ;;  %v2588_v42 = vadd.f32 %v2587_v24, %v2547_v23  ;;  %v2300_v43 = vmax.f32 %v2246_v4, 0.0  ;;  %v2548_v44 = vmax.f32 %v2494_v31, 0.0  ;;  %v3240_v14 = vpop.f32.mrb[56].mxu1  ;;  %v3304_v18 = vpop.f32.mrb[88].mxu0 }
 0x521   : > { %v3241_v45 = vpop.f32.mrb[57].mxu1  ;;  %v3305_v46 = vpop.f32.mrb[89].mxu0 }
 0x522   : > { %v2563_v49 = vadd.f32 %v2562_v9, %v2300_v43  ;;  %v2589_v22 = vadd.f32 %v2588_v42, %v2548_v44  ;;  %v3242_v50 = vadd.f32 %v3241_v45, %v3240_v14  ;;  %v3306_v27 = vadd.f32 %v3305_v46, %v3304_v18  ;;  %v3243_v51 = vpop.f32.mrb[58].mxu1  ;;  %v3307_v53 = vpop.f32.mrb[90].mxu0 }
 0x523   : > { %v3244_v55 = vpop.f32.mrb[59].mxu1  ;;  %v3308_v29 = vpop.f32.mrb[91].mxu0 }
 0x524   : > { %v2251_v56 = vadd.f32 %v3242_v50, %v4735_v48  ;;  %v2499_v37 = vadd.f32 %v3306_v27, %v4740_v61  ;;  %v3245_v57 = vadd.f32 %v3244_v55, %v3243_v51  ;;  %v3309_v38 = vadd.f32 %v3308_v29, %v3307_v53 }
 0x526   : > { %v2301_v39 = vmax.f32 %v2251_v56, 0.0  ;;  %v2549_v41 = vmax.f32 %v2499_v37, 0.0  ;;  %v2254_v58 = vadd.f32 %v3245_v57, %v4735_v48  ;;  %v2502_v59 = vadd.f32 %v3309_v38, %v4740_v61 }
 0x528   : > { %v2564_v62 = vadd.f32 %v2563_v49, %v2301_v39  ;;  %v2590_v52 = vadd.f32 %v2589_v22, %v2549_v41  ;;  %v2302_v36 = vmax.f32 %v2254_v58, 0.0  ;;  %v2550_v12 = vmax.f32 %v2502_v59, 0.0  ;;  %v3246_v63 = vpop.f32.mrb[60].mxu1  ;;  %v3310_v54 = vpop.f32.mrb[92].mxu0 }
 0x529   : > { %v3247_v35 = vpop.f32.mrb[61].mxu1  ;;  %v3311_v1 = vpop.f32.mrb[93].mxu0 }
 0x52a   : > { %v2565_v40 = vadd.f32 %v2564_v62, %v2302_v36  ;;  %v2591_v2 = vadd.f32 %v2590_v52, %v2550_v12  ;;  %v3248_v60 = vadd.f32 %v3247_v35, %v3246_v63  ;;  %v3312_v3 = vadd.f32 %v3311_v1, %v3310_v54  ;;  %v3249_v5 = vpop.f32.mrb[62].mxu1  ;;  %v3313_v47 = vpop.f32.mrb[94].mxu0 }
 0x52b   : > { %v3250_v6 = vpop.f32.mrb[63].mxu1  ;;  %v3314_v0 = vpop.f32.mrb[95].mxu0 }
 0x52c   : > { %v2259_v8 = vadd.f32 %v3248_v60, %v4735_v48  ;;  %v2507_v10 = vadd.f32 %v3312_v3, %v4740_v61  ;;  %v3251_v30 = vadd.f32 %v3250_v6, %v3249_v5  ;;  %v3315_v13 = vadd.f32 %v3314_v0, %v3313_v47 }
 0x52e   : > { %v2303_v15 = vmax.f32 %v2259_v8, 0.0  ;;  %v2551_v16 = vmax.f32 %v2507_v10, 0.0  ;;  %v2262_v24 = vadd.f32 %v3251_v30, %v4735_v48  ;;  %v2510_v17 = vadd.f32 %v3315_v13, %v4740_v61 }
 0x530   : > { %v2566_v19 = vadd.f32 %v2565_v40, %v2303_v15  ;;  %v2592_v20 = vadd.f32 %v2591_v2, %v2551_v16  ;;  %v2304_v21 = vmax.f32 %v2262_v24, 0.0  ;;  %v2552_v25 = vmax.f32 %v2510_v17, 0.0  ;;  %v3252_v28 = vpop.f32.mrb[64].mxu1  ;;  %v3316_v32 = vpop.f32.mrb[96].mxu0 }
 0x531   : > { %v3253_v33 = vpop.f32.mrb[65].mxu1  ;;  %v3317_v7 = vpop.f32.mrb[97].mxu0 }
 0x532   : > { %v4758_v11 = vadd.f32 %v2566_v19, %v2304_v21  ;;  %v4760_v34 = vadd.f32 %v2592_v20, %v2552_v25  ;;  %v3254_v23 = vadd.f32 %v3253_v33, %v3252_v28  ;;  %v3318_v4 = vadd.f32 %v3317_v7, %v3316_v32  ;;  %v3255_v31 = vpop.f32.mrb[66].mxu1  ;;  %v3319_v9 = vpop.f32.mrb[98].mxu0 }
 0x533   : > { %v3256_v42 = vpop.f32.mrb[67].mxu1  ;;  %v3320_v43 = vpop.f32.mrb[99].mxu0 }
 0x534   : > { %v2267_v44 = vadd.f32 %v3254_v23, %v4735_v48  ;;  %v2515_v14 = vadd.f32 %v3318_v4, %v4740_v61  ;;  %v3257_v18 = vadd.f32 %v3256_v42, %v3255_v31  ;;  %v3321_v45 = vadd.f32 %v3320_v43, %v3319_v9 }
 0x536   : > { %v2270_v46 = vadd.f32 %v3257_v18, %v4735_v48  ;;  %v2518_v49 = vadd.f32 %v3321_v45, %v4740_v61  ;;  %v2305_v27 = vmax.f32 %v2267_v44, 0.0  ;;  %v2553_v51 = vmax.f32 %v2515_v14, 0.0 }
 0x537   : > { %v2568_v14 = vrot.slane %v4758_v11, 4 }
 0x538   : > { %v3258_v22 = vpop.f32.mrb[68].mxu1  ;;  %v3322_v50 = vpop.f32.mrb[100].mxu0  ;;  %v2306_v53 = vmax.f32 %v2270_v46, 0.0  ;;  %v2554_v55 = vmax.f32 %v2518_v49, 0.0 }
 0x539   : > { %v3259_v29 = vpop.f32.mrb[69].mxu1  ;;  %v3323_v56 = vpop.f32.mrb[101].mxu0 }
 0x53a   : > { %v3260_v37 = vadd.f32 %v3259_v29, %v3258_v22  ;;  %v3324_v57 = vadd.f32 %v3323_v56, %v3322_v50  ;;  %v3261_v38 = vpop.f32.mrb[70].mxu1  ;;  %v3325_v39 = vpop.f32.mrb[102].mxu0  ;;  %v2574_v41 = vadd.f32 %v2306_v53, %v2305_v27  ;;  %v2600_v58 = vadd.f32 %v2554_v55, %v2553_v51 }
 0x53b   : > { %v3262_v59 = vpop.f32.mrb[71].mxu1  ;;  %v3326_v62 = vpop.f32.mrb[103].mxu0  ;;  %v2569_v51 = vadd.f32 %v2568_v14, %v4758_v11  ;;  %v2780_v14 = vld [vmem:[#allocation10 + $0x88] sm:$0xff] (!%p3184_p0) }
 0x53c   : > { %v2275_v52 = vadd.f32 %v3260_v37, %v4735_v48  ;;  %v2523_v36 = vadd.f32 %v3324_v57, %v4740_v61  ;;  %v3263_v12 = vadd.f32 %v3262_v59, %v3261_v38  ;;  %v3327_v63 = vadd.f32 %v3326_v62, %v3325_v39 }
 0x53d   : > { %v2594_v57 = vrot.slane %v4760_v34, 4  ;;  %v2570_v39 = vrot.slane %v2569_v51, 2 }
 0x53e   : > { %v2307_v54 = vmax.f32 %v2275_v52, 0.0  ;;  %v2555_v35 = vmax.f32 %v2523_v36, 0.0  ;;  %v2278_v1 = vadd.f32 %v3263_v12, %v4735_v48  ;;  %v2526_v40 = vadd.f32 %v3327_v63, %v4740_v61 }
 0x53f   : > { %v2595_v11 = vadd.f32 %v2594_v57, %v4760_v34  ;;  %v2571_v63 = vadd.f32 %v2570_v39, %v2569_v51  ;;  %v2765_v51 = vld [vmem:[#allocation10 + $0x10] sm:$0xff] (!%p3184_p0)  ;;  %v2767_v57 = vld [vmem:[#allocation10 + $0x20] sm:$0xff] (!%p3184_p0) }
 0x540   : > { %v2575_v2 = vadd.f32 %v2574_v41, %v2307_v54  ;;  %v2601_v60 = vadd.f32 %v2600_v58, %v2555_v35  ;;  %v3264_v3 = vpop.f32.mrb[72].mxu1  ;;  %v3328_v5 = vpop.f32.mrb[104].mxu0  ;;  %v2308_v47 = vmax.f32 %v2278_v1, 0.0  ;;  %v2556_v6 = vmax.f32 %v2526_v40, 0.0  ;;  %v2632_v1 = vld [vmem:[#allocation3] sm:$0x3] }
 0x541   : > { %v3265_v0 = vpop.f32.mrb[73].mxu1  ;;  %v3329_v8 = vpop.f32.mrb[105].mxu0  ;;  %v2785_v39 = vld [vmem:[#allocation10 + $0xb0] sm:$0xff] (!%p3184_p0) }
 0x542   : > { %v3266_v10 = vadd.f32 %v3265_v0, %v3264_v3  ;;  %v3330_v30 = vadd.f32 %v3329_v8, %v3328_v5  ;;  %v3267_v13 = vpop.f32.mrb[74].mxu1  ;;  %v3331_v15 = vpop.f32.mrb[106].mxu0  ;;  %v2576_v16 = vadd.f32 %v2575_v2, %v2308_v47  ;;  %v2602_v24 = vadd.f32 %v2601_v60, %v2556_v6 }
 0x543   : > { %v3268_v17 = vpop.f32.mrb[75].mxu1  ;;  %v3332_v19 = vpop.f32.mrb[107].mxu0  ;;  %v2572_v6 = vrot.slane %v2571_v63, 1  ;;  %v2596_v0 = vrot.slane %v2595_v11, 2 }
 0x544   : > { %v2283_v20 = vadd.f32 %v3266_v10, %v4735_v48  ;;  %v2531_v21 = vadd.f32 %v3330_v30, %v4740_v61  ;;  %v3269_v25 = vadd.f32 %v3268_v17, %v3267_v13  ;;  %v3333_v28 = vadd.f32 %v3332_v19, %v3331_v15 }
 0x545   : > { %v2573_v34 = vadd.f32 %v2572_v6, %v2571_v63  ;;  %v2597_v15 = vadd.f32 %v2596_v0, %v2595_v11  ;;  %v3928_v17 = vmov 1983009808   ;;  %v2773_v6 = vld [vmem:[#allocation10 + $0x50] sm:$0xff] (!%p3184_p0)  ;;  %v2774_v0 = vld [vmem:[#allocation10 + $0x58] sm:$0xff] (!%p3184_p0) }
 0x546   : > { %v2309_v32 = vmax.f32 %v2283_v20, 0.0  ;;  %v2557_v33 = vmax.f32 %v2531_v21, 0.0  ;;  %v2286_v7 = vadd.f32 %v3269_v25, %v4735_v48  ;;  %v2534_v23 = vadd.f32 %v3333_v28, %v4740_v61 }
 0x547   : > { %v2598_v21 = vrot.slane %v2597_v15, 1 }
 0x548   : > { %v2577_v4 = vadd.f32 %v2576_v16, %v2309_v32  ;;  %v2603_v31 = vadd.f32 %v2602_v24, %v2557_v33  ;;  %v2310_v9 = vmax.f32 %v2286_v7, 0.0  ;;  %v2558_v42 = vmax.f32 %v2534_v23, 0.0  ;;  %v3270_v43 = vpop.f32.mrb[76].mxu1 }
 0x549   : > { %v3271_v44 = vpop.f32.mrb[77].mxu1  ;;  %v2599_v33 = vadd.f32 %v2598_v21, %v2597_v15  ;;  %v2776_v15 = vld [vmem:[#allocation10 + $0x68] sm:$0xff] (!%p3184_p0) }
 0x54a   : > { %v2578_v18 = vadd.f32 %v2577_v4, %v2310_v9  ;;  %v2604_v45 = vadd.f32 %v2603_v31, %v2558_v42  ;;  %v3272_v46 = vadd.f32 %v3271_v44, %v3270_v43  ;;  %v3273_v49 = vpop.f32.mrb[78].mxu1  ;;  %v2613_v9 = vld [vmem:[#allocation2] sm:$0xf]  ;;  %v2779_v44 = vld [vmem:[#allocation10 + $0x80] sm:$0xff] (!%p3184_p0) }
 0x54b   : > { %v3274_v22 = vpop.f32.mrb[79].mxu1 }
 0x54c   : > { %v2291_v50 = vadd.f32 %v3272_v46, %v4735_v48  ;;  %v3275_v27 = vadd.f32 %v3274_v22, %v3273_v49  ;;  %v2764_v46 = vld [vmem:[#allocation10 + $0x8] sm:$0xff] (!%p3184_p0)  ;;  %v2781_v49 = vld [vmem:[#allocation10 + $0x90] sm:$0xff] (!%p3184_p0)  ;;  %v2782_v22 = vld [vmem:[#allocation10 + $0x98] sm:$0xff] (!%p3184_p0) }
 0x54e   : > { %v2311_v53 = vmax.f32 %v2291_v50, 0.0  ;;  %v2294_v55 = vadd.f32 %v3275_v27, %v4735_v48  ;;  %v3428_v27 = vpack.c.bf16 (!%p3184_p0), %v2782_v22, %v2781_v49 }
 0x550   : > { %v2579_v29 = vadd.f32 %v2578_v18, %v2311_v53  ;;  %v2312_v56 = vmax.f32 %v2294_v55, 0.0  ;;  %v3334_v37 = vpop.f32.mrb[80].mxu1  ;;  %v2763_v18 = vld [vmem:[#allocation10] sm:$0xff] (!%p3184_p0)  ;;  %v2766_v53 = vld [vmem:[#allocation10 + $0x18] sm:$0xff] (!%p3184_p0) }
 0x551   : > { %v3335_v38 = vpop.f32.mrb[81].mxu1  ;;  %v3426_v50 = vpack.c.bf16 (!%p3184_p0), %v2764_v46, %v2763_v18  ;;  %v2783_v55 = vld [vmem:[#allocation10 + $0xa0] sm:$0xff] (!%p3184_p0) }
 0x552   : > { %v2580_v41 = vadd.f32 %v2579_v29, %v2312_v56  ;;  %v3336_v58 = vadd.f32 %v3335_v38, %v3334_v37  ;;  %v3337_v59 = vpop.f32.mrb[82].mxu1  ;;  %v2784_v29 = vld [vmem:[#allocation10 + $0xa8] sm:$0xff] (!%p3184_p0)  ;;  %v3430_v56 = vpack.c.bf16 (!%p3184_p0), %v2766_v53, %v2765_v51 }
 0x553   : > { %v3338_v62 = vpop.f32.mrb[83].mxu1  ;;  %v3432_v37 = vpack.c.bf16 (!%p3184_p0), %v2784_v29, %v2783_v55  ;;  %v2768_v38 = vld [vmem:[#allocation10 + $0x28] sm:$0xff] (!%p3184_p0) }
 0x554   : > { %v2581_v52 = vrot.slane %v2580_v41, 4  ;;  %v2539_v36 = vadd.f32 %v3336_v58, %v4740_v61  ;;  %v3339_v12 = vadd.f32 %v3338_v62, %v3337_v59  ;;  %v3434_v58 = vpack.c.bf16 (!%p3184_p0), %v2768_v38, %v2767_v57  ;;  %v2769_v62 = vld [vmem:[#allocation10 + $0x30] sm:$0xff] (!%p3184_p0) }
 0x556   : > { %v2582_v54 = vadd.f32 %v2581_v52, %v2580_v41  ;;  %v2559_v48 = vmax.f32 %v2539_v36, 0.0  ;;  %v2542_v35 = vadd.f32 %v3339_v12, %v4740_v61  ;;  %v2623_v61 = vunpack.c.l.s4 %v3928_v17  ;;  %v2786_v41 = vld [vmem:[#allocation10 + $0xb8] sm:$0xff] (!%p3184_p0)  ;;  %v2787_v36 = vld [vmem:[#allocation10 + $0xc0] sm:$0xff] (!%p3184_p0)  ;;  %v2788_v12 = vld [vmem:[#allocation10 + $0xc8] sm:$0xff] (!%p3184_p0) }
 0x557   : > { %v3436_v59 = vpack.c.bf16 (!%p3184_p0), %v2786_v41, %v2785_v39  ;;  %v2770_v52 = vld [vmem:[#allocation10 + $0x38] sm:$0xff] (!%p3184_p0) }
 0x558   : > { %v2583_v40 = vrot.slane %v2582_v54, 2  ;;  %v2605_v2 = vadd.f32 %v2604_v45, %v2559_v48  ;;  %v2560_v60 = vmax.f32 %v2542_v35, 0.0  ;;  %v2751_v3 = vpop.f32.mrb[84].mxu1  ;;  %v2624_v28 = vunpack.c.0.s8 %v2623_v61  ;;  %v2771_v35 = vld [vmem:[#allocation10 + $0x40] sm:$0xff] (!%p3184_p0) }
 0x559   : > { %v2755_v5 = vadd.f32 %v2751_v3, %v2632_v1  ;;  %v3423_v47 = vpop.f32.mrb[85].mxu1  ;;  %v3424_v45 = vpack.c.bf16 (!%p3184_p0), %v2780_v14, %v2779_v44  ;;  %v3440_v48 = vpack.c.bf16 (!%p3184_p0), %v2788_v12, %v2787_v36  ;;  %v2772_v1 = vld [vmem:[#allocation10 + $0x48] sm:$0xff] (!%p3184_p0) }
 0x55a   : > { %v2584_v8 = vadd.f32 %v2583_v40, %v2582_v54  ;;  %v2606_v10 = vadd.f32 %v2605_v2, %v2560_v60  ;;  %v2627_v23 = vsub.s32 %v2624_v28, %v4528_v26  ;;  %v3438_v54 = vpack.c.bf16 (!%p3184_p0), %v2770_v52, %v2769_v62  ;;  %v2789_v2 = vld [vmem:[#allocation10 + $0xd0] sm:$0xff] (!%p3184_p0)  ;;  %v2790_v60 = vld [vmem:[#allocation10 + $0xd8] sm:$0xff] (!%p3184_p0) }
 0x55b   : > { %2756 = vst [vmem:[#allocation3] sm:$0x3] %v2755_v5  ;;  %3425 = vmatprep.subr.bf16.mxu0 (!%p3184_p0), %v3424_v45  ;;  %v3442_v5 = vpack.c.bf16 (!%p3184_p0), %v2772_v1, %v2771_v35  ;;  %v3444_v47 = vpack.c.bf16 (!%p3184_p0), %v2790_v60, %v2789_v2 }
 0x55c   : > { %v2585_v30 = vrot.slane %v2584_v8, 1  ;;  %v2607_v13 = vrot.slane %v2606_v10, 4  ;;  %3427 = vmatpush3.bf16.msra.mxu0 (!%p3184_p0), %v3426_v50 }
 0x55d   : > { %3429 = vmatprep.subr.bf16.mxu0 (!%p3184_p0), %v3428_v27 }
 0x55e   : > { %v2586_v16 = vadd.f32 %v2585_v30, %v2584_v8  ;;  %v2608_v24 = vadd.f32 %v2607_v13, %v2606_v10  ;;  %v2791_v8 = vld [vmem:[#allocation10 + $0xe0] sm:$0xff] (!%p3184_p0)  ;;  %v2792_v10 = vld [vmem:[#allocation10 + $0xe8] sm:$0xff] (!%p3184_p0)  ;;  %v3446_v30 = vpack.c.bf16 (!%p3184_p0), %v2774_v0, %v2773_v6 }
 0x55f   : > { %v3448_v13 = vpack.c.bf16 (!%p3184_p0), %v2792_v10, %v2791_v8 }
 0x560   : > { %v2617_v19 = vsel %vm2616_vm4, %v2586_v16, %v2573_v34  ;;  %v2609_v20 = vrot.slane %v2608_v24, 2  ;;  %3431 = vmatpush3.bf16.msra.mxu0 (!%p3184_p0), %v3430_v56  ;;  %v2775_v34 = vld [vmem:[#allocation10 + $0x60] sm:$0xff] (!%p3184_p0)  ;;  %v2793_v16 = vld [vmem:[#allocation10 + $0xf0] sm:$0xff] (!%p3184_p0) }
 0x561   : > { %3433 = vmatprep.subr.bf16.mxu0 (!%p3184_p0), %v3432_v37  ;;  %v3450_v17 = vpack.c.bf16 (!%p3184_p0), %v2776_v15, %v2775_v34 }
 0x562   : > { %v2610_v25 = vadd.f32 %v2609_v20, %v2608_v24  ;;  %v2794_v24 = vld [vmem:[#allocation10 + $0xf8] sm:$0xff] (!%p3184_p0) }
 0x563   : > { %v3452_v61 = vpack.c.bf16 (!%p3184_p0), %v2794_v24, %v2793_v16  ;;  %v2778_v20 = vld [vmem:[#allocation10 + $0x78] sm:$0xff] (!%p3184_p0) }
 0x564   : > { %v2611_v32 = vrot.slane %v2610_v25, 1  ;;  %3435 = vmatpush3.bf16.msra.mxu0 (!%p3184_p0), %v3434_v58 }
 0x565   : > { %3437 = vmatprep.subr.bf16.mxu0 (!%p3184_p0), %v3436_v59 }
 0x566   : > { %v2612_v7 = vadd.f32 %v2611_v32, %v2610_v25  ;;  %v3929_v25 = vmov (!%p3184_p0), 1966171168   ;;  %v2883_v32 = vld [vmem:[#allocation3] sm:$0x3] (!%p3184_p0) }
 0x567   : > { %v2888_v28 = vunpack.c.l.s4 (!%p3184_p0), %v3929_v25 }
 0x568   : > { %v2620_v4 = vsel %vm2616_vm4, %v2612_v7, %v2599_v33  ;;  %3439 = vmatpush3.bf16.msra.mxu0 (!%p3184_p0), %v3438_v54 }
 0x569   : > { %v2621_v31 = vcombine.low %v2617_v19, %v2620_v4  ;;  %2760 = sbr.rel (%p3184_p0) target bundleno = 1630 (0x65e), region = 146  ;;  %3441 = vmatprep.subr.bf16.mxu0 (!%p3184_p0), %v3440_v48  ;;  %v2777_v19 = vld [vmem:[#allocation10 + $0x70] sm:$0xff] (!%p3184_p0)  ;;  %v2889_v7 = vunpack.c.0.s8 (!%p3184_p0), %v2888_v28 }
 0x56a   : > { %v3454_v21 = vpack.c.bf16 (!%p3184_p0), %v2778_v20, %v2777_v19 }
 0x56b   : > { %v2628_v42 = vrot.slane %v2621_v31, %v2627_v23 }
 0x56c   : > { %3443 = vmatpush3.bf16.msra.mxu0 (!%p3184_p0), %v3442_v5 }
 0x56d   : > { %v2630_v43 = vadd.f32 %v2628_v42, %v2613_v9  ;;  %3445 = vmatprep.subr.bf16.mxu0 (!%p3184_p0), %v3444_v47  ;;  %v2884_v9 = vmul.f32 (!%p3184_p0), 0.0078125, %v2883_v32 }
 0x56f   : > { %2631 = vst [vmem:[#allocation2] sm:$0xf] %v2630_v43  ;;  %v2892_v43 = vsub.s32 (!%p3184_p0), %v2889_v7, %v4528_v26 }
 0x570   : > { %3447 = vmatpush3.bf16.msra.mxu0 %v3446_v30 }
 0x571   : > { %3449 = vmatprep.subr.bf16.mxu0 %v3448_v13 }
 0x574   : > { %3451 = vmatpush3.bf16.msra.mxu0 %v3450_v17 }
 0x575   : > { %3453 = vmatprep.subr.bf16.mxu0 %v3452_v61 }
 0x576   : > { %v2761_v11 = vld [vmem:[#allocation2] sm:$0xf] }
 0x577   : > { %v2762_v63 = vmul.f32 0.0078125, %v2761_v11 }
 0x578   : > { %3455 = vmatpush3.bf16.msra.mxu0 %v3454_v21 }
 0x579   : > { %v2809_v40 = vrot.slane %v2762_v63, %v2627_v23  ;;  %v3185_v23 = vld [vmem:[%s4880_s24] ss:$0 sm:$0xff] }
 0x57b   : > { %v2810_v3 = vcombine.high %v2809_v40, %v2809_v40 }
 0x57d   : > { %2877 = vmatprep.mubr.f32.mxu0 %v2810_v3 }
 0x57e   : > { %2878 = vmatmul.mubr.f32.vlgmr.msra.gmra.mrb[0].mxu0 %v2809_v40 }
 0x651   : > { %v3374_v33 = vpop.f32.mrb[0].mxu0 }
 0x652   : > { %v3375_v4 = vpop.f32.mrb[1].mxu0 }
 0x653   : > { %v3376_v31 = vadd.f32 %v3375_v4, %v3374_v33 }
 0x655   : > { %v2880_v42 = vadd.f32 %v3376_v31, %v3185_v23 }
 0x657   : > { %v2885_v44 = vadd.f32 %v2884_v9, %v2880_v42 }
 0x659   : > { %v2893_v14 = vrot.slane %v2885_v44, %v2892_v43 }
 0x65b   : > { %v2894_v18 = vcombine.high %v2893_v14, %v2893_v14  ;;  %3186 = vst.sshfl [vmem:[%s4229_s15] sm:$0x1 pattern:$0x73625140] %v2893_v14 }
 0x65d   : > { %3187 = vst.sshfl [vmem:[%s4229_s15 + $0x1] sm:$0x1 pattern:$0x73625140] %v2894_v18 }
 0x65e PF: > { %s29_s27 = sadd.s32 1, %s3914_s27   ;;  %s4881_s14 = sld [smem:[#allocation18_spill]] }
 0x65f   : > { %p26_p1 = scmp.ge.s32.totalorder %s29_s27, 6   ;;  %s4882_s9 = sld [smem:[#allocation16_spill]] }
 0x660   : > { %s4883_s12 = sld [smem:[#allocation17_spill]]  ;;  %s4884_s21 = smov %s3894_s22 }
 0x661   : > { %s4886_s23 = smov %s3906_s25  ;;  %s4887_s24 = smov %s3910_s26 }
 0x662   :  { %28 = sbr.rel (!%p26_p1) target bundleno = 20 (0x14), region = 182 }
 0x664   : > { %s4885_s22 = smov %s4881_s14 }
 0x665   : > { %s4888_s25 = smov %s4882_s9 }
 0x666   : > { %s4889_s26 = smov %s4883_s12 }
 0x669   :  { %2933 = vsyncpa [#allocation6], 1 }
 0x66a   :  { %2935 = vsyncpa [#allocation6 + $0x1], 1 }
 0x66b   :  { %2936 = vsyncpa [#allocation8], 1 }
 0x66c   :  { %2937 = vsyncpa [#allocation11], 1 }

</bundles_post_ra>
